<compile_context>
chip_gen: v6e
topology: v6e:2x2x1
jax: 0.10.0
libtpu: 0.0.40
codegen_flags: <defaults>
</compile_context>

<pallas_src>
import jax
import jax.numpy as jnp
from jax.experimental import pallas as pl
from jax.experimental.pallas import tpu as pltpu


def gcn_classifier_kernel(h0_ref, adj_ref, pool_ref, w_ref, b_ref, out_ref):
    # One grid step = GB graphs, stacked along the node axis.
    h0 = h0_ref[...]            # (GB*N, PAD)   lane-padded node features
    adj = adj_ref[0]            # (GB*N, GB*N)  block-diagonal normalized adjacency
    pool = pool_ref[...]        # (GB, GB*N)    block-diag mean-pool matrix (1/N rows)
    b = b_ref[...]              # (4, PAD)      packed biases
    b1, b2, bm1, bm2 = b[0:1], b[1:2], b[2:3], b[3:4]

    # ---- GraphConvolution 1 + ReLU :  relu(adj @ (h0 @ W1) + b1) -------------
    xw1 = jnp.dot(h0, w_ref[0], preferred_element_type=jnp.float32)
    h1 = jnp.maximum(
        jnp.dot(adj, xw1, preferred_element_type=jnp.float32) + b1, 0.0)

    # ---- GraphConvolution 2 + ReLU -------------------------------------------
    xw2 = jnp.dot(h1, w_ref[1], preferred_element_type=jnp.float32)
    h2 = jnp.maximum(
        jnp.dot(adj, xw2, preferred_element_type=jnp.float32) + b2, 0.0)

    # ---- Per-graph mean pool over nodes as one (GB,GB*N)@(GB*N,PAD) matmul ---
    hg = jnp.dot(pool, h2, preferred_element_type=jnp.float32)        # (GB, PAD)

    # ---- MLP on the whole GB-graph batch: Linear -> ReLU -> Dropout(eval) -> Linear
    z = jnp.maximum(
        jnp.dot(hg, w_ref[2], preferred_element_type=jnp.float32) + bm1, 0.0)
    out_ref[...] = (
        jnp.dot(z, w_ref[3], preferred_element_type=jnp.float32) + bm2)


def gcn_classifier(h0_flat, adj_bd, pool, w_slab, b_slab):
    """h0_flat: (G*N, PAD) f32 lane-padded node features (graphs stacked),
    adj_bd:  (S, GB*N, GB*N) f32 block-diag normalized adjacency, S = G//GB,
    pool:    (GB, GB*N) f32 block-diag mean-pool matrix (rows of 1/N),
    w_slab:  (4, PAD, PAD) packed zero-padded weights [W1, W2, WM1, WM2],
    b_slab:  (4, PAD) packed zero-padded biases [b1, b2, bm1, bm2].
    Returns (G, PAD) logits (only the first n_labels lanes are meaningful)."""
    S, GBN, _ = adj_bd.shape
    GB = pool.shape[0]
    total_nodes, PAD = h0_flat.shape
    assert total_nodes == S * GBN and pool.shape[1] == GBN
    G = S * GB

    return pl.pallas_call(
        gcn_classifier_kernel,
        out_shape=jax.ShapeDtypeStruct((G, PAD), jnp.float32),
        grid_spec=pltpu.PrefetchScalarGridSpec(
            num_scalar_prefetch=0,
            grid=(S,),
            in_specs=[
                pl.BlockSpec((GBN, PAD), lambda s: (s, 0)),       # GB graphs' feats
                pl.BlockSpec((1, GBN, GBN), lambda s: (s, 0, 0)),  # block-diag adj
                pl.BlockSpec((GB, GBN), lambda s: (0, 0)),         # shared pool mat
                pl.BlockSpec((4, PAD, PAD), lambda s: (0, 0, 0)),  # shared weights
                pl.BlockSpec((4, PAD), lambda s: (0, 0)),          # shared biases
            ],
            out_specs=pl.BlockSpec((GB, PAD), lambda s: (s, 0)),   # dense (32,128)
        ),
        compiler_params=pltpu.CompilerParams(
            dimension_semantics=("parallel",)),
    )(h0_flat, adj_bd, pool, w_slab, b_slab)


def _pad_to(x, shape):
    return jnp.pad(x, [(0, s - d) for d, s in zip(x.shape, shape)])


if __name__ == "__main__":
    # ---- small, deterministic problem sizes ----------------------------------
    VOCAB = 50           # pretrained embedding table rows
    E = 29               # pretrained embedding dim
    L = 4                # words per node (padded sentence length)
    N = 8                # nodes per graph
    GB = 32              # graphs per grid step -> GB*N = 256 MXU rows (v6e/v7x)
    S = 2                # grid steps (>= 2 keeps both v7x TensorCores busy)
    G = S * GB           # total graphs
    GCN_IN = E + 3       # word emb + (f, lf, ll) scalar features = 32
    HID = 32             # GCN hidden size
    MLP_H = HID // 4     # MLP hidden size
    N_LABELS = 4
    PAD = 128            # lane-dense padding for all feature/hidden/label dims
    GBN = GB * N

    key = jax.random.PRNGKey(0)
    ks = jax.random.split(key, 13)

    # nn.Embedding.from_pretrained(pretrained_emb, padding_idx=1)
    emb_table = jax.random.normal(ks[0], (VOCAB, E), jnp.float32) * 0.1
    emb_table = emb_table.at[1].set(0.0)

    # per-graph node data
    p = jax.random.randint(ks[1], (G, N, L), 0, VOCAB)                      # word ids
    ml = jax.random.randint(ks[2], (G, N), 1, L + 1).astype(jnp.float32)    # sent lens
    feats = jax.random.normal(ks[3], (G, N, 3), jnp.float32)                # f, lf, ll

    # per-graph directed graphs -> symmetric-normalized dense adjacency
    A = (jax.random.uniform(ks[12], (G, N, N)) < 0.35).astype(jnp.float32)
    in_deg = jnp.maximum(A.sum(axis=2), 1.0)    # (G, N) per-dst
    out_deg = jnp.maximum(A.sum(axis=1), 1.0)   # (G, N) per-src
    adj_norm = (in_deg[:, :, None] ** -0.5) * A * (out_deg[:, None, :] ** -0.5)

    # deterministic parameters (GraphConvolution weights are (in, out); x @ W + b)
    s = 0.1
    params = {
        "w1":  jax.random.normal(ks[4],  (GCN_IN, HID), jnp.float32) * s,
        "b1":  jax.random.normal(ks[5],  (1, HID), jnp.float32) * s,
        "w2":  jax.random.normal(ks[6],  (HID, HID), jnp.float32) * s,
        "b2":  jax.random.normal(ks[7],  (1, HID), jnp.float32) * s,
        "wm1": jax.random.normal(ks[8],  (HID, MLP_H), jnp.float32) * s,
        "bm1": jax.random.normal(ks[9],  (1, MLP_H), jnp.float32) * s,
        "wm2": jax.random.normal(ks[10], (MLP_H, N_LABELS), jnp.float32) * s,
        "bm2": jax.random.normal(ks[11], (1, N_LABELS), jnp.float32) * s,
    }

    # ---- wrapper glue (fuses with the embedding gather) ----------------------
    word_embs = emb_table[p]                              # (G, N, L, E)
    inv_ml = 1.0 / jnp.maximum(ml, 1.0)                   # guard against len 0
    word = word_embs.sum(axis=2) * inv_ml[..., None]      # (G, N, E)
    h0 = jnp.concatenate([word, feats], axis=-1)          # (G, N, GCN_IN)
    h0_pad = _pad_to(h0, (G, N, PAD))                     # lane-dense
    h0_flat = h0_pad.reshape(G * N, PAD)                  # graphs stacked on rows

    # block-diagonal adjacency: one (GB*N, GB*N) matrix per grid step
    adj_steps = adj_norm.reshape(S, GB, N, N)
    eye_gb = jnp.eye(GB, dtype=jnp.float32)
    adj_bd = jnp.einsum("sgab,gh->sgahb", adj_steps, eye_gb).reshape(S, GBN, GBN)

    # block-diag mean-pool matrix: row g has 1/N over graph g's node rows
    pool_mat = jnp.kron(eye_gb, jnp.ones((1, N), jnp.float32) / N)   # (GB, GB*N)

    # pack parameters into 2 zero-padded slabs (exact: padded rows/cols are 0)
    w_slab = jnp.stack([
        _pad_to(params["w1"],  (PAD, PAD)),
        _pad_to(params["w2"],  (PAD, PAD)),
        _pad_to(params["wm1"], (PAD, PAD)),
        _pad_to(params["wm2"], (PAD, PAD)),
    ])                                                    # (4, PAD, PAD)
    b_slab = jnp.concatenate([
        _pad_to(params["b1"],  (1, PAD)),
        _pad_to(params["b2"],  (1, PAD)),
        _pad_to(params["bm1"], (1, PAD)),
        _pad_to(params["bm2"], (1, PAD)),
    ], axis=0)                                            # (4, PAD)

    pred_pad = gcn_classifier(h0_flat, adj_bd, pool_mat, w_slab, b_slab)
    pred_pad = jax.block_until_ready(pred_pad)            # (G, PAD)
    pred = pred_pad[:, :N_LABELS]                         # (G, N_LABELS)

    # ---- pure-JAX reference of the same forward pass (unpadded) --------------
    xw1 = h0 @ params["w1"]
    h1 = jax.nn.relu(jnp.einsum("gij,gjk->gik", adj_norm, xw1) + params["b1"])
    xw2 = h1 @ params["w2"]
    h2 = jax.nn.relu(jnp.einsum("gij,gjk->gik", adj_norm, xw2) + params["b2"])
    hg = h2.mean(axis=1)                                  # (G, HID)
    ref = (jax.nn.relu(hg @ params["wm1"] + params["bm1"]) @ params["wm2"]
           + params["bm2"])                               # (G, N_LABELS)

    assert pred.shape == (G, N_LABELS)
    assert jnp.allclose(pred, ref, atol=1e-4, rtol=1e-4)
    # padded label lanes must stay exactly zero (bias slab zero-padding)
    assert jnp.allclose(pred_pad[:, N_LABELS:], 0.0, atol=1e-6)
    print("KERNEL_OK")
</pallas_src>

<mosaic_0001>
module attributes {stable_mosaic.version = 11 : i64} {
  func.func @gcn_classifier_kernel(%arg0: i32, %arg1: memref<256x128xf32, #tpu.memory_space<vmem>>, %arg2: memref<1x256x256xf32, #tpu.memory_space<vmem>>, %arg3: memref<32x256xf32, #tpu.memory_space<vmem>>, %arg4: memref<4x128x128xf32, #tpu.memory_space<vmem>>, %arg5: memref<4x128xf32, #tpu.memory_space<vmem>>, %arg6: memref<32x128xf32, #tpu.memory_space<vmem>>) attributes {dimension_semantics = [#tpu.dimension_semantics<parallel>], iteration_bounds = array<i64: 2>, scalar_prefetch = 0 : i64, scratch_operands = 0 : i64, tpu.core_type = #tpu.core_type<tc>, window_params = [{transform_indices = @transform_0, window_bounds = array<i64: 256, 128>}, {transform_indices = @transform_1, window_bounds = array<i64: 1, 256, 256>}, {pipeline_mode = #tpu.pipeline_mode<synchronous>, transform_indices = @transform_2, window_bounds = array<i64: 32, 256>}, {pipeline_mode = #tpu.pipeline_mode<synchronous>, transform_indices = @transform_3, window_bounds = array<i64: 4, 128, 128>}, {pipeline_mode = #tpu.pipeline_mode<synchronous>, transform_indices = @transform_4, window_bounds = array<i64: 4, 128>}, {transform_indices = @transform_5, window_bounds = array<i64: 32, 128>}]} {
    %c0 = arith.constant 0 : index
    %c0_0 = arith.constant 0 : index
    %0 = vector.load %arg1[%c0, %c0_0] : memref<256x128xf32, #tpu.memory_space<vmem>>, vector<256x128xf32>
    %c0_1 = arith.constant 0 : index
    %c0_2 = arith.constant 0 : index
    %c0_3 = arith.constant 0 : index
    %1 = vector.load %arg2[%c0_1, %c0_2, %c0_3] : memref<1x256x256xf32, #tpu.memory_space<vmem>>, vector<1x256x256xf32>
    %2 = vector.shape_cast %1 : vector<1x256x256xf32> to vector<256x256xf32>
    %c0_4 = arith.constant 0 : index
    %c0_5 = arith.constant 0 : index
    %3 = vector.load %arg3[%c0_4, %c0_5] : memref<32x256xf32, #tpu.memory_space<vmem>>, vector<32x256xf32>
    %c0_6 = arith.constant 0 : index
    %c0_7 = arith.constant 0 : index
    %4 = vector.load %arg5[%c0_6, %c0_7] : memref<4x128xf32, #tpu.memory_space<vmem>>, vector<4x128xf32>
    %5 = vector.extract_strided_slice %4 {offsets = [0, 0], sizes = [1, 128], strides = [1, 1]} : vector<4x128xf32> to vector<1x128xf32>
    %6 = vector.extract_strided_slice %4 {offsets = [1, 0], sizes = [1, 128], strides = [1, 1]} : vector<4x128xf32> to vector<1x128xf32>
    %7 = vector.extract_strided_slice %4 {offsets = [2, 0], sizes = [1, 128], strides = [1, 1]} : vector<4x128xf32> to vector<1x128xf32>
    %8 = vector.extract_strided_slice %4 {offsets = [3, 0], sizes = [1, 128], strides = [1, 1]} : vector<4x128xf32> to vector<1x128xf32>
    %c0_8 = arith.constant 0 : index
    %c0_9 = arith.constant 0 : index
    %c0_10 = arith.constant 0 : index
    %9 = vector.load %arg4[%c0_8, %c0_9, %c0_10] : memref<4x128x128xf32, #tpu.memory_space<vmem>>, vector<1x128x128xf32>
    %10 = vector.shape_cast %9 : vector<1x128x128xf32> to vector<128x128xf32>
    %cst = arith.constant dense<0.000000e+00> : vector<256x128xf32>
    %11 = tpu.matmul %0, %10, %cst {dimension_numbers = #tpu.dot_dimension_numbers<[1], [0], [0], [1], [0, 0, 1, 1], [], []>} : vector<256x128xf32>, vector<128x128xf32>, vector<256x128xf32> -> vector<256x128xf32>
    %cst_11 = arith.constant dense<0.000000e+00> : vector<256x128xf32>
    %12 = tpu.matmul %2, %11, %cst_11 {dimension_numbers = #tpu.dot_dimension_numbers<[1], [0], [0], [1], [0, 0, 1, 1], [], []>} : vector<256x256xf32>, vector<256x128xf32>, vector<256x128xf32> -> vector<256x128xf32>
    %13 = vector.broadcast %5 : vector<1x128xf32> to vector<256x128xf32>
    %14 = arith.addf %12, %13 : vector<256x128xf32>
    %cst_12 = arith.constant 0.000000e+00 : f32
    %15 = vector.broadcast %cst_12 : f32 to vector<256x128xf32>
    %16 = arith.maximumf %14, %15 : vector<256x128xf32>
    %c1 = arith.constant 1 : index
    %c0_13 = arith.constant 0 : index
    %c0_14 = arith.constant 0 : index
    %17 = vector.load %arg4[%c1, %c0_13, %c0_14] : memref<4x128x128xf32, #tpu.memory_space<vmem>>, vector<1x128x128xf32>
    %18 = vector.shape_cast %17 : vector<1x128x128xf32> to vector<128x128xf32>
    %cst_15 = arith.constant dense<0.000000e+00> : vector<256x128xf32>
    %19 = tpu.matmul %16, %18, %cst_15 {dimension_numbers = #tpu.dot_dimension_numbers<[1], [0], [0], [1], [0, 0, 1, 1], [], []>} : vector<256x128xf32>, vector<128x128xf32>, vector<256x128xf32> -> vector<256x128xf32>
    %cst_16 = arith.constant dense<0.000000e+00> : vector<256x128xf32>
    %20 = tpu.matmul %2, %19, %cst_16 {dimension_numbers = #tpu.dot_dimension_numbers<[1], [0], [0], [1], [0, 0, 1, 1], [], []>} : vector<256x256xf32>, vector<256x128xf32>, vector<256x128xf32> -> vector<256x128xf32>
    %21 = vector.broadcast %6 : vector<1x128xf32> to vector<256x128xf32>
    %22 = arith.addf %20, %21 : vector<256x128xf32>
    %cst_17 = arith.constant 0.000000e+00 : f32
    %23 = vector.broadcast %cst_17 : f32 to vector<256x128xf32>
    %24 = arith.maximumf %22, %23 : vector<256x128xf32>
    %cst_18 = arith.constant dense<0.000000e+00> : vector<32x128xf32>
    %25 = tpu.matmul %3, %24, %cst_18 {dimension_numbers = #tpu.dot_dimension_numbers<[1], [0], [0], [1], [0, 0, 1, 1], [], []>} : vector<32x256xf32>, vector<256x128xf32>, vector<32x128xf32> -> vector<32x128xf32>
    %c2 = arith.constant 2 : index
    %c0_19 = arith.constant 0 : index
    %c0_20 = arith.constant 0 : index
    %26 = vector.load %arg4[%c2, %c0_19, %c0_20] : memref<4x128x128xf32, #tpu.memory_space<vmem>>, vector<1x128x128xf32>
    %27 = vector.shape_cast %26 : vector<1x128x128xf32> to vector<128x128xf32>
    %cst_21 = arith.constant dense<0.000000e+00> : vector<32x128xf32>
    %28 = tpu.matmul %25, %27, %cst_21 {dimension_numbers = #tpu.dot_dimension_numbers<[1], [0], [0], [1], [0, 0, 1, 1], [], []>} : vector<32x128xf32>, vector<128x128xf32>, vector<32x128xf32> -> vector<32x128xf32>
    %29 = vector.broadcast %7 : vector<1x128xf32> to vector<32x128xf32>
    %30 = arith.addf %28, %29 : vector<32x128xf32>
    %cst_22 = arith.constant 0.000000e+00 : f32
    %31 = vector.broadcast %cst_22 : f32 to vector<32x128xf32>
    %32 = arith.maximumf %30, %31 : vector<32x128xf32>
    %c3 = arith.constant 3 : index
    %c0_23 = arith.constant 0 : index
    %c0_24 = arith.constant 0 : index
    %33 = vector.load %arg4[%c3, %c0_23, %c0_24] : memref<4x128x128xf32, #tpu.memory_space<vmem>>, vector<1x128x128xf32>
    %34 = vector.shape_cast %33 : vector<1x128x128xf32> to vector<128x128xf32>
    %cst_25 = arith.constant dense<0.000000e+00> : vector<32x128xf32>
    %35 = tpu.matmul %32, %34, %cst_25 {dimension_numbers = #tpu.dot_dimension_numbers<[1], [0], [0], [1], [0, 0, 1, 1], [], []>} : vector<32x128xf32>, vector<128x128xf32>, vector<32x128xf32> -> vector<32x128xf32>
    %36 = vector.broadcast %8 : vector<1x128xf32> to vector<32x128xf32>
    %37 = arith.addf %35, %36 : vector<32x128xf32>
    %c0_26 = arith.constant 0 : index
    %c0_27 = arith.constant 0 : index
    %38 = vector.load %arg6[%c0_26, %c0_27] : memref<32x128xf32, #tpu.memory_space<vmem>>, vector<32x128xf32>
    tpu.vector_store %arg6[%c0_26, %c0_27], %37 {strides = array<i32>} : memref<32x128xf32, #tpu.memory_space<vmem>>, vector<32x128xf32>,
    return
  }
  func.func @transform_0(%arg0: i32) -> (i32, i32) {
    %c0_i32 = arith.constant 0 : i32
    %c0_i32_0 = arith.constant 0 : i32
    return %arg0, %c0_i32 : i32, i32
  }
  func.func @transform_1(%arg0: i32) -> (i32, i32, i32) {
    %c0_i32 = arith.constant 0 : i32
    %c0_i32_0 = arith.constant 0 : i32
    %c0_i32_1 = arith.constant 0 : i32
    return %arg0, %c0_i32, %c0_i32_0 : i32, i32, i32
  }
  func.func @transform_2(%arg0: i32) -> (i32, i32) {
    %c0_i32 = arith.constant 0 : i32
    %c0_i32_0 = arith.constant 0 : i32
    %c0_i32_1 = arith.constant 0 : i32
    return %c0_i32, %c0_i32_0 : i32, i32
  }
  func.func @transform_3(%arg0: i32) -> (i32, i32, i32) {
    %c0_i32 = arith.constant 0 : i32
    %c0_i32_0 = arith.constant 0 : i32
    %c0_i32_1 = arith.constant 0 : i32
    %c0_i32_2 = arith.constant 0 : i32
    return %c0_i32, %c0_i32_0, %c0_i32_1 : i32, i32, i32
  }
  func.func @transform_4(%arg0: i32) -> (i32, i32) {
    %c0_i32 = arith.constant 0 : i32
    %c0_i32_0 = arith.constant 0 : i32
    %c0_i32_1 = arith.constant 0 : i32
    return %c0_i32, %c0_i32_0 : i32, i32
  }
  func.func @transform_5(%arg0: i32) -> (i32, i32) {
    %c0_i32 = arith.constant 0 : i32
    %c0_i32_0 = arith.constant 0 : i32
    return %arg0, %c0_i32 : i32, i32
  }
}

</mosaic_0001>

<bundles_post_ra>
// kernel: tpu_custom_call.1
= control target key start
LH: loop header
LB: loop body
LE: loop exit
PB: predicated region body
PF: predicated region fallthrough
CT: control target
= control target key end

     0   :  { %s3427_s0 = inlined_call_operand.hbm [shape: f32[512,128], index: 0, kind: input, shape index: {}]   ;;  %s3428_s1 = inlined_call_operand.hbm [shape: f32[2,256,256], index: 1, kind: input, shape index: {}]   ;;  %s3429_s2 = inlined_call_operand.hbm [shape: f32[32,256], index: 2, kind: input, shape index: {}]   ;;  %s3430_s3 = inlined_call_operand.hbm [shape: f32[4,128,128], index: 3, kind: input, shape index: {}]   ;;  %s3431_s4 = inlined_call_operand.vmem [shape: f32[4,128], index: 4, kind: input, shape index: {}]   ;;  %s3432_s5 = inlined_call_operand.hbm [shape: f32[64,128], index: 5, kind: output, shape index: {}]  }
   0x1   :  { %3463 = sst [smem:[#allocation37_spill]] %s3427_s0 }
   0x2   :  { %3464 = sst [smem:[#allocation38_spill]] %s3429_s2 }
   0x3   :  { %3465 = sst [smem:[#allocation39_spill]] %s3430_s3 }
   0x4   :  { %10 = vsyncpa [#allocation3], 0 }
   0x5   :  { %12 = vsyncpa [#allocation3 + $0x1], 0 }
   0x6   :  { %13 = vsyncpa [#allocation6], 0 }
   0x7   :  { %15 = vsyncpa [#allocation6 + $0x1], 0 }
   0x8   :  { %16 = vsyncpa [#allocation9], 0 }
   0x9   :  { %17 = vsyncpa [#allocation4], 0 }
   0xa   :  { %19 = vsyncpa [#allocation4 + $0x1], 0  ;;  %s2607_s18 = smov 0   ;;  %s2609_s19 = smov 0  }
   0xb   :  { %s2611_s20 = smov 0   ;;  %s2613_s21 = smov 0  }
   0xc LB: > { %s2628_s22 = sadd.s32 4294967295, %s2563_s21   ;;  %s1858_s23 = sadd.s32 4294967294, %s2563_s21   ;;  %s2563_s21 = sphi %s2613_s21, %s3534_s21   ;;  %s2559_s20 = sphi %s2611_s20, %s3533_s20   ;;  %s2555_s19 = sphi %s2609_s19, %s3532_s19   ;;  %s2551_s18 = sphi %s2607_s18, %s3531_s18  }
   0xd   : > { %p45_p0 = scmp.ne.s32.totalorder %s2555_s19, %s2551_s18  ;;  %p3436_p1 = scmp.eq.s32.totalorder %s2628_s22, 0 }
   0xe   : > { %p158_p2 = scmp.eq.s32.totalorder %s2628_s22, 1  ;;  %p164_p3 = scmp.eq.s32.totalorder %s1858_s23, 1 }
   0xf   : > { %p2637_p4 = por %p3436_p1, %p45_p0  ;;  %p1859_p5 = scmp.ge.s32.totalorder %s2563_s21, 1 }
  0x10   : > { %p2642_p6 = por %p164_p3, %p45_p0  ;;  %p171_p7 = scmp.lt.s32.totalorder %s2563_s21, 3 }
  0x11   : > { %s3466_s24 = scalar_select %p2637_p4, 1, 0 }
  0x12   : > { %s3467_s25 = scalar_select %p2642_p6, 1, 0 }
  0x13   : > { %p2647_p8 = pnand %p1859_p5, %p171_p7  ;;  %s2565_s27 = smov [#allocation7]  }
  0x14   : > { %s183_s28 = sshll.u32 %s2565_s27, 4  ;;  %s2566_s30 = smov [#allocation8]   ;;  %s184_s28 = int_to_ptr.vmem [resolvable:$true] %s183_s28 }
  0x15   : > { %p2313_p9 = pneg %p2647_p8  ;;  %s196_s6 = sshll.u32 %s2566_s30, 4  ;;  %s197_s6 = int_to_ptr.vmem [resolvable:$true] %s196_s6 }
  0x16   : > { %s2390_s7 = scalar_lea.vmem %s184_s28, 1024  ;;  %p2398_p5 = scmp.lt.s32.totalorder %s184_s28, %s184_s28 }
  0x17   : > { %p2656_p11 = pnand %p2313_p9, %p3436_p1  ;;  %p2391_p13 = scmp.ne.s32.totalorder %s184_s28, %s2390_s7 }
  0x18   : > { %p2399_p7 = scmp.lt.s32.totalorder %s2390_s7, %s2390_s7 }
  0x19   : > { %p2381_p12 = pneg %p2656_p11 }
  0x1a   : > { %p2400_p10 = por %p2399_p7, %p2398_p5 }
  0x1b   : > { %p2393_p0 = pnand %p2391_p13, %p2381_p12 }
  0x1d   : > { %p2394_p3 = pneg %p2393_p0 }
  0x1f   : > { %p2401_p9 = pnand %p2400_p10, %p2394_p3 }
  0x21   : > { %2404 = shalt.err (!%p2401_p9)
}
  0x22   : > { %s3433_s8 = smov 256   ;;  %s3434_s9 = smov 16  }
  0x23   : > { %s3470_s2 = sld [smem:[#allocation38_spill]]  ;;  %s2416_s12 = scalar_lea.vmem %s197_s6, 8192 }
  0x24   : > { %p2417_p13 = scmp.ne.s32.totalorder %s197_s6, %s2416_s12  ;;  %p2424_p10 = scmp.lt.s32.totalorder %s197_s6, %s197_s6 }
  0x25   : > { %p2425_p3 = scmp.lt.s32.totalorder %s2416_s12, %s2416_s12 }
  0x26   : > { %p2419_p0 = pnand %p2417_p13, %p2381_p12 }
  0x27   : > { %p2426_p7 = por %p2425_p3, %p2424_p10 }
  0x28   : > { %p2420_p5 = pneg %p2419_p0 }
  0x29   : > { %2316 = dma.hbm_to_vmem [thread:$0]  (!%p2656_p11), %s3470_s2, 1024, %s184_s28, [#allocation6], %s3433_s8, %s3433_s8, %s3434_s9  }
  0x2a   : > { %p2427_p9 = pnand %p2426_p7, %p2420_p5 }
  0x2c   : > { %2430 = shalt.err (!%p2427_p9)
}
  0x2d   : > { %s3435_s13 = smov 128   ;;  %s2570_s14 = smov 8  }
  0x2e   : > { %s3471_s3 = sld [smem:[#allocation39_spill]]  ;;  %s2685_s17 = sadd.s32 1, %s2563_s21  }
  0x2f   : > { %s29_s23 = ssub.s32 %s2563_s21, %s2685_s17  ;;  %s32_s27 = sadd.s32 1, %s2559_s20 }
  0x30   : > { %p30_p12 = scmp.eq.s32.totalorder %s29_s23, 0  ;;  %p39_p13 = scmp.ne.s32.totalorder %s2559_s20, %s2555_s19 }
  0x31   : > { %p40_p0 = scmp.eq.s32.totalorder %s2563_s21, 0  ;;  %p2333_p3 = scmp.lt.s32.totalorder %s2563_s21, 2 }
  0x32   : > { %s2694_s28 = scalar_select %p30_p12, %s2559_s20, %s32_s27  }
  0x33   : > { %p41_p5 = por %p40_p0, %p39_p13  ;;  %p2698_p10 = por %p158_p2, %p39_p13 }
  0x34   : > { %2319 = dma.hbm_to_vmem [thread:$0]  (!%p2656_p11), %s3471_s3, 8192, %s197_s6, [#allocation9], %s3435_s13, %s3435_s13, %s2570_s14  }
  0x35   : > { %s3472_s29 = scalar_select %p2698_p10, 1, 0 }
  0x36   : > { %s2704_s30 = sand.u32 1, %s2559_s20   ;;  %s1880_s7 = sshll.u32 %s2563_s21, 12 }
  0x37   : > { %s1863_s6 = sshll.u32 %s2704_s30, 8  ;;  %s3473_s0 = sld [smem:[#allocation37_spill]] }
  0x38   : > { %s217_s15 = scalar_lea.vmem [#allocation2], %s1863_s6  ;;  %p2715_p2 = pnand %p2333_p3, %p41_p5 }
  0x39   : > { %s224_s16 = sshll.u32 %s217_s15, 4  ;;  %s214_s9 = scalar_lea.sflag [#allocation3], %s2704_s30  ;;  %s2713_s16 = int_to_ptr.vmem [resolvable:$true] %s224_s16 }
  0x3a   : > { %p2433_p7 = pneg %p2715_p2 }
  0x3d   : > { %s2711_s12 = scalar_lea.hbm %s3473_s0, %s1880_s7  ;;  %s2436_s10 = scalar_lea.hbm %s3473_s0, 8192 }
  0x3e   : > { %s2431_s13 = scalar_lea.hbm %s2711_s12, 4096  ;;  %p2437_p13 = scmp.lt.s32.totalorder %s2711_s12, %s3473_s0 }
  0x3f   : > { %p2432_p11 = scmp.ne.s32.totalorder %s2711_s12, %s2431_s13  ;;  %p2438_p0 = scmp.lt.s32.totalorder %s2436_s10, %s2431_s13 }
  0x41   : > { %p2434_p9 = pnand %p2433_p7, %p2432_p11  ;;  %p2439_p5 = por %p2438_p0, %p2437_p13 }
  0x43   : > { %p2435_p12 = pneg %p2434_p9 }
  0x45   : > { %p2440_p3 = pnand %p2439_p5, %p2435_p12 }
  0x47   : > { %2443 = shalt.err (!%p2440_p3)
}
  0x48   : > { %s2444_s27 = scalar_lea.vmem %s2713_s16, 4096  ;;  %s2571_s6 = smov [#allocation2]  }
  0x49   : > { %p2445_p1 = scmp.ne.s32.totalorder %s2713_s16, %s2444_s27  ;;  %s2449_s7 = sshll.u32 %s2571_s6, 4  ;;  %s2450_s7 = int_to_ptr.vmem [resolvable:$false] %s2449_s7 }
  0x4a   : > { %s2451_s8 = scalar_lea.vmem %s2450_s7, 8192  ;;  %p2452_p6 = scmp.lt.s32.totalorder %s2713_s16, %s2450_s7 }
  0x4b   : > { %p2447_p11 = pnand %p2445_p1, %p2433_p7  ;;  %p2453_p10 = scmp.lt.s32.totalorder %s2451_s8, %s2444_s27 }
  0x4d   : > { %p2448_p9 = pneg %p2447_p11  ;;  %p2454_p4 = por %p2453_p10, %p2452_p6 }
  0x4f   : > { %p2455_p13 = pnand %p2454_p4, %p2448_p9 }
  0x51   : > { %2458 = shalt.err (!%p2455_p13)
}
  0x52   : > { %s3475_s13 = smov 128   ;;  %s1881_s10 = sshll.u32 %s2563_s21, 13 }
  0x53   : > { %2323 = dma.hbm_to_vmem [thread:$0]  (!%p2715_p2), %s2711_s12, 4096, %s2713_s16, %s214_s9, %s3475_s13, %s3475_s13, %s2570_s14  }
  0x54   : > { %s2755_s27 = scalar_lea.hbm %s3428_s1, %s1881_s10  ;;  %s3476_s15 = sshll.u32 %s2704_s30, 9 }
  0x55   : > { %s238_s6 = scalar_lea.vmem [#allocation5], %s3476_s15  ;;  %s3477_s0 = sand.u32 1, %s2563_s21  }
  0x56   : > { %s245_s7 = sshll.u32 %s238_s6, 4  ;;  %s235_s2 = scalar_lea.sflag [#allocation6], %s3477_s0  ;;  %s2759_s7 = int_to_ptr.vmem [resolvable:$true] %s245_s7 }
  0x57   : > { %s2459_s3 = scalar_lea.hbm %s2755_s27, 8192  ;;  %s2464_s12 = scalar_lea.hbm %s3428_s1, 16384 }
  0x58   : > { %p2460_p1 = scmp.ne.s32.totalorder %s2755_s27, %s2459_s3  ;;  %p2465_p10 = scmp.lt.s32.totalorder %s2755_s27, %s3428_s1 }
  0x59   : > { %p2466_p12 = scmp.lt.s32.totalorder %s2464_s12, %s2459_s3 }
  0x5a   : > { %p2462_p4 = pnand %p2460_p1, %p2433_p7 }
  0x5b   : > { %p2467_p0 = por %p2466_p12, %p2465_p10 }
  0x5c   : > { %p2463_p6 = pneg %p2462_p4 }
  0x5e   : > { %p2468_p5 = pnand %p2467_p0, %p2463_p6 }
  0x60   : > { %2471 = shalt.err (!%p2468_p5)
}
  0x61   : > { %s2472_s0 = scalar_lea.vmem %s2759_s7, 8192  ;;  %s2572_s13 = smov [#allocation5]  }
  0x62   : > { %p2473_p3 = scmp.ne.s32.totalorder %s2759_s7, %s2472_s0  ;;  %s2477_s10 = sshll.u32 %s2572_s13, 4  ;;  %s2478_s10 = int_to_ptr.vmem [resolvable:$false] %s2477_s10 }
  0x63   : > { %s2479_s11 = scalar_lea.vmem %s2478_s10, 16384  ;;  %p2480_p13 = scmp.lt.s32.totalorder %s2759_s7, %s2478_s10 }
  0x64   : > { %p2475_p11 = pnand %p2473_p3, %p2433_p7  ;;  %p2481_p1 = scmp.lt.s32.totalorder %s2479_s11, %s2472_s0 }
  0x66   : > { %p2476_p9 = pneg %p2475_p11  ;;  %p2482_p4 = por %p2481_p1, %p2480_p13 }
  0x68   : > { %p2483_p10 = pnand %p2482_p4, %p2476_p9 }
  0x6a   : > { %2486 = shalt.err (!%p2483_p10)
}
  0x6b   : > { %s3478_s3 = smov 16   ;;  %s3479_s8 = smov 256  }
  0x6c   : > { %2326 = dma.hbm_to_vmem [thread:$0]  (!%p2715_p2), %s2755_s27, 8192, %s2759_s7, %s235_s2, %s3479_s8, %s3479_s8, %s3478_s3  }
  0x6d   : > { %257 = sbr.rel (%p2647_p8) target bundleno = 1963 (0x7ab), region = 40 }
  0x72   : > { %s2791_s15 = sand.u32 1, %s2555_s19   ;;  %p3480_p7 = scmp.ne.s32.totalorder %s3466_s24, 0 }
  0x73   : > { %s1870_s6 = sshll.u32 %s2791_s15, 8  ;;  %s260_s9 = scalar_lea.sflag [#allocation3], %s2791_s15 }
  0x74   : > { %s2795_s14 = scalar_lea.vmem [#allocation2], %s1870_s6 }
  0x75   : > { %2530 = dma.done.wait (%p3480_p7), %s260_s9, 4096  }
  0x76   : > { %2532 = vsyncadd (%p3480_p7), %s260_s9, 4294963200  ;;  %s268_s2 = sand.u32 1, %s2628_s22   ;;  %s1871_s26 = sshll.u32 %s2791_s15, 9 }
  0x77   : > { %s269_s23 = scalar_lea.sflag [#allocation6], %s268_s2  ;;  %s2803_s27 = scalar_lea.vmem [#allocation5], %s1871_s26 }
  0x78   : > { %2534 = dma.done.wait (%p3480_p7), %s269_s23, 8192  }
  0x79   : > { %2536 = vsyncadd (%p3480_p7), %s269_s23, 4294959104  ;;  %p3481_p8 = scmp.eq.s32.totalorder %s2628_s22, 0 }
  0x7b   : > { %2538 = dma.done.wait (%p3481_p8), [#allocation6], 1024   ;;  %p3482_p2 = pmov %p3481_p8 }
  0x7d   : > { %2540 = vsyncadd (%p3482_p2), [#allocation6], 4294966272  ;;  %p3483_p6 = pmov %p3482_p2 }
  0x7e   : > { %p3484_p12 = pmov %p3482_p2 }
  0x7f   : > { %2542 = dma.done.wait (%p3483_p6), [#allocation9], 8192  }
  0x80   : > { %2544 = vsyncadd (%p3484_p12), [#allocation9], 4294959104  ;;  %v434_v0 = vld [vmem:[#allocation8 + $0x78] sm:$0xff]  ;;  %v433_v1 = vld [vmem:[#allocation8 + $0x70] sm:$0xff]  ;;  %v3439_v48 = vmov 0.0   ;;  %s1874_s16 = sshll.u32 %s2791_s15, 5 }
  0x81   : > { %2063 = vmatprep.subr.mxu0 %v434_v0  ;;  %v432_v2 = vld [vmem:[#allocation8 + $0x68] sm:$0xff]  ;;  %v431_v3 = vld [vmem:[#allocation8 + $0x60] sm:$0xff]  ;;  %v430_v5 = vld [vmem:[#allocation8 + $0x58] sm:$0xff]  ;;  %664 = vmatprep.subr.mxu1 %v3439_v48  ;;  %s311_s0 = scalar_lea.vmem [#allocation10], %s1874_s16  ;;  %s1882_s10 = sshll.u32 %s2628_s22, 9 }
  0x82   : > { %2064 = vmatpush3.msra.mxu0 %v434_v0  ;;  %v314_v4 = vld [vmem:[%s2795_s14] sm:$0xff]  ;;  %v429_v6 = vld [vmem:[#allocation8 + $0x50] sm:$0xff]  ;;  %v428_v7 = vld [vmem:[#allocation8 + $0x48] sm:$0xff]  ;;  %s1743_s13 = sshll.u32 %s311_s0, 4  ;;  %s3384_s8 = scalar_lea.hbm %s3432_s5, %s1882_s10  ;;  %s3379_s13 = int_to_ptr.vmem [resolvable:$true] %s1743_s13 }
  0x83   : > { %2065 = vmatprep.subr.mxu0 %v433_v1  ;;  %2095 = vmatprep.mubr.f32.mxu0 %v314_v4  ;;  %v427_v8 = vld [vmem:[#allocation8 + $0x40] sm:$0xff]  ;;  %v426_v9 = vld [vmem:[#allocation8 + $0x38] sm:$0xff]  ;;  %v425_v10 = vld [vmem:[#allocation8 + $0x30] sm:$0xff]  ;;  %s1730_s6 = scalar_lea.sflag [#allocation4], %s2791_s15  ;;  %s2487_s9 = scalar_lea.vmem %s3379_s13, 512 }
  0x84   : > { %2066 = vmatpush3.msra.mxu0 %v433_v1  ;;  %v424_v11 = vld [vmem:[#allocation8 + $0x28] sm:$0xff]  ;;  %v423_v12 = vld [vmem:[#allocation8 + $0x20] sm:$0xff]  ;;  %v422_v13 = vld [vmem:[#allocation8 + $0x18] sm:$0xff]  ;;  %p2488_p0 = scmp.ne.s32.totalorder %s3379_s13, %s2487_s9  ;;  %p3528_p5 = scmp.ne.s32.totalorder %s3472_s29, 0 }
  0x85   : > { %2067 = vmatprep.subr.mxu0 %v432_v2  ;;  %v421_v14 = vld [vmem:[#allocation8 + $0x10] sm:$0xff]  ;;  %v420_v15 = vld [vmem:[#allocation8 + $0x8] sm:$0xff]  ;;  %v419_v16 = vld [vmem:[#allocation8] sm:$0xff]  ;;  %s2574_s22 = smov [#allocation10]  }
  0x86   : > { %2068 = vmatpush3.msra.mxu0 %v432_v2  ;;  %v315_v17 = vld [vmem:[%s2795_s14 + $0x8] sm:$0xff]  ;;  %v316_v18 = vld [vmem:[%s2795_s14 + $0x10] sm:$0xff]  ;;  %v317_v19 = vld [vmem:[%s2795_s14 + $0x18] sm:$0xff]  ;;  %p2489_p3 = pnand %p2488_p0, %p3528_p5 }
  0x87   : > { %2069 = vmatprep.subr.mxu0 %v431_v3  ;;  %v318_v20 = vld [vmem:[%s2795_s14 + $0x20] sm:$0xff]  ;;  %v319_v21 = vld [vmem:[%s2795_s14 + $0x28] sm:$0xff]  ;;  %v320_v22 = vld [vmem:[%s2795_s14 + $0x30] sm:$0xff] }
  0x88   : > { %2070 = vmatpush3.msra.mxu0 %v431_v3  ;;  %v321_v23 = vld [vmem:[%s2795_s14 + $0x38] sm:$0xff]  ;;  %v322_v24 = vld [vmem:[%s2795_s14 + $0x40] sm:$0xff]  ;;  %v323_v25 = vld [vmem:[%s2795_s14 + $0x48] sm:$0xff]  ;;  %p2490_p11 = pneg %p2489_p3 }
  0x89   : > { %2071 = vmatprep.subr.mxu0 %v430_v5  ;;  %v324_v26 = vld [vmem:[%s2795_s14 + $0x50] sm:$0xff]  ;;  %v325_v27 = vld [vmem:[%s2795_s14 + $0x58] sm:$0xff]  ;;  %v326_v28 = vld [vmem:[%s2795_s14 + $0x60] sm:$0xff] }
  0x8a   : > { %2072 = vmatpush3.msra.mxu0 %v430_v5  ;;  %v327_v29 = vld [vmem:[%s2795_s14 + $0x68] sm:$0xff]  ;;  %v328_v30 = vld [vmem:[%s2795_s14 + $0x70] sm:$0xff]  ;;  %v329_v31 = vld [vmem:[%s2795_s14 + $0x78] sm:$0xff] }
  0x8b   : > { %2073 = vmatprep.subr.mxu0 %v429_v6  ;;  %v330_v32 = vld [vmem:[%s2795_s14 + $0x80] sm:$0xff]  ;;  %v331_v33 = vld [vmem:[%s2795_s14 + $0x88] sm:$0xff]  ;;  %v332_v34 = vld [vmem:[%s2795_s14 + $0x90] sm:$0xff] }
  0x8c   : > { %2074 = vmatpush3.msra.mxu0 %v429_v6  ;;  %v333_v35 = vld [vmem:[%s2795_s14 + $0x98] sm:$0xff]  ;;  %v334_v36 = vld [vmem:[%s2795_s14 + $0xa0] sm:$0xff]  ;;  %v335_v37 = vld [vmem:[%s2795_s14 + $0xa8] sm:$0xff] }
  0x8d   : > { %2075 = vmatprep.subr.mxu0 %v428_v7  ;;  %v336_v38 = vld [vmem:[%s2795_s14 + $0xb0] sm:$0xff]  ;;  %v337_v39 = vld [vmem:[%s2795_s14 + $0xb8] sm:$0xff]  ;;  %v338_v40 = vld [vmem:[%s2795_s14 + $0xc0] sm:$0xff] }
  0x8e   : > { %2076 = vmatpush3.msra.mxu0 %v428_v7  ;;  %v339_v41 = vld [vmem:[%s2795_s14 + $0xc8] sm:$0xff]  ;;  %v340_v42 = vld [vmem:[%s2795_s14 + $0xd0] sm:$0xff]  ;;  %v341_v43 = vld [vmem:[%s2795_s14 + $0xd8] sm:$0xff] }
  0x8f   : > { %2077 = vmatprep.subr.mxu0 %v427_v8  ;;  %v342_v44 = vld [vmem:[%s2795_s14 + $0xe0] sm:$0xff]  ;;  %v343_v45 = vld [vmem:[%s2795_s14 + $0xe8] sm:$0xff]  ;;  %v344_v46 = vld [vmem:[%s2795_s14 + $0xf0] sm:$0xff] }
  0x90   : > { %2078 = vmatpush3.msra.mxu0 %v427_v8  ;;  %v345_v47 = vld [vmem:[%s2795_s14 + $0xf8] sm:$0xff]  ;;  %v2851_v49 = vld [vmem:[%s2803_s27 + $0x8] sm:$0xff]  ;;  %s2491_s14 = sshll.u32 %s2574_s22, 4  ;;  %s2492_s14 = int_to_ptr.vmem [resolvable:$false] %s2491_s14 }
  0x91   : > { %2079 = vmatprep.subr.mxu0 %v426_v9  ;;  %728 = vmatprep.mubr.f32.mxu1 %v2851_v49  ;;  %s2493_s2 = scalar_lea.vmem %s2492_s14, 1024  ;;  %p2494_p9 = scmp.lt.s32.totalorder %s3379_s13, %s2492_s14 }
  0x92   : > { %2080 = vmatpush3.msra.mxu0 %v426_v9  ;;  %p2495_p13 = scmp.lt.s32.totalorder %s2493_s2, %s2487_s9 }
  0x93   : > { %2081 = vmatprep.subr.mxu0 %v425_v10 }
  0x94   : > { %2082 = vmatpush3.msra.mxu0 %v425_v10  ;;  %p2496_p1 = por %p2495_p13, %p2494_p9 }
  0x95   : > { %2083 = vmatprep.subr.mxu0 %v424_v11 }
  0x96   : > { %2084 = vmatpush3.msra.mxu0 %v424_v11  ;;  %p2497_p4 = pnand %p2496_p1, %p2490_p11 }
  0x97   : > { %2085 = vmatprep.subr.mxu0 %v423_v12 }
  0x98   : > { %2086 = vmatpush3.msra.mxu0 %v423_v12 }
  0x99   : > { %2087 = vmatprep.subr.mxu0 %v422_v13 }
  0x9a   : > { %2088 = vmatpush3.msra.mxu0 %v422_v13 }
  0x9b   : > { %2089 = vmatprep.subr.mxu0 %v421_v14 }
  0x9c   : > { %2090 = vmatpush3.msra.mxu0 %v421_v14 }
  0x9d   : > { %2091 = vmatprep.subr.mxu0 %v420_v15 }
  0x9e   : > { %2092 = vmatpush3.msra.mxu0 %v420_v15 }
  0x9f   : > { %2093 = vmatprep.subr.mxu0 %v419_v16 }
  0xa0   : > { %2094 = vmatpush3.msra.mxu0 %v419_v16 }
  0xa1   : > { %2096 = vmatmul.mubr.f32.vlgmr.msra.gmra.mxu0 %v315_v17 }
  0xa2   : > { %2098 = vmatprep.mubr.f32.mxu0 %v316_v18  ;;  %v937_v18 = vld [vmem:[#allocation8 + $0xf8] sm:$0xff] }
  0xa3   : > { %2143 = vmatprep.subr.mxu0 %v937_v18 }
  0xa4   : > { %2144 = vmatpush3.msra.mxu0 %v937_v18  ;;  %v3077_v18 = vld [vmem:[%s2803_s27 + $0x170] sm:$0xff] }
  0xa5   : > { %2099 = vmatmul.mubr.f32.gmra.mxu0 %v317_v19  ;;  %v936_v19 = vld [vmem:[#allocation8 + $0xf0] sm:$0xff]  ;;  %3487 = vst [vmem:[#allocation18_spill] sm:$0xff] %v3077_v18 }
  0xa6   : > { %2101 = vmatprep.mubr.f32.mxu0 %v318_v20  ;;  %v2890_v20 = vld [vmem:[%s2803_s27] sm:$0xff]  ;;  %2145 = vmatprep.subr.mxu0 %v936_v19 }
  0xa7   : > { %2146 = vmatpush3.msra.mxu0 %v936_v19  ;;  %v3080_v19 = vld [vmem:[%s2803_s27 + $0x188] sm:$0xff] }
  0xa8   : > { %3488 = vst [vmem:[#allocation19_spill] sm:$0xff] %v3080_v19 }
  0xa9   : > { %2102 = vmatmul.mubr.f32.gmra.mxu0 %v319_v21  ;;  %v2894_v21 = vld [vmem:[%s2803_s27 + $0x18] sm:$0xff] }
  0xaa   : > { %2104 = vmatprep.mubr.f32.mxu0 %v320_v22  ;;  %v935_v22 = vld [vmem:[#allocation8 + $0xe8] sm:$0xff] }
  0xab   : > { %2147 = vmatprep.subr.mxu0 %v935_v22 }
  0xac   : > { %2148 = vmatpush3.msra.mxu0 %v935_v22  ;;  %v3085_v22 = vld [vmem:[%s2803_s27 + $0x180] sm:$0xff] }
  0xad   : > { %2105 = vmatmul.mubr.f32.gmra.mxu0 %v321_v23  ;;  %v934_v23 = vld [vmem:[#allocation8 + $0xe0] sm:$0xff]  ;;  %3489 = vst [vmem:[#allocation20_spill] sm:$0xff] %v3085_v22 }
  0xae   : > { %2107 = vmatprep.mubr.f32.mxu0 %v322_v24  ;;  %v2900_v24 = vld [vmem:[%s2803_s27 + $0x10] sm:$0xff]  ;;  %2149 = vmatprep.subr.mxu0 %v934_v23 }
  0xaf   : > { %2150 = vmatpush3.msra.mxu0 %v934_v23  ;;  %v3088_v23 = vld [vmem:[%s2803_s27 + $0x198] sm:$0xff] }
  0xb0   : > { %3490 = vst [vmem:[#allocation21_spill] sm:$0xff] %v3088_v23 }
  0xb1   : > { %2108 = vmatmul.mubr.f32.gmra.mxu0 %v323_v25  ;;  %v2903_v25 = vld [vmem:[%s2803_s27 + $0x28] sm:$0xff] }
  0xb2   : > { %2110 = vmatprep.mubr.f32.mxu0 %v324_v26  ;;  %v933_v26 = vld [vmem:[#allocation8 + $0xd8] sm:$0xff] }
  0xb3   : > { %2151 = vmatprep.subr.mxu0 %v933_v26 }
  0xb4   : > { %2152 = vmatpush3.msra.mxu0 %v933_v26  ;;  %v3093_v26 = vld [vmem:[%s2803_s27 + $0x190] sm:$0xff] }
  0xb5   : > { %2111 = vmatmul.mubr.f32.gmra.mxu0 %v325_v27  ;;  %v932_v27 = vld [vmem:[#allocation8 + $0xd0] sm:$0xff]  ;;  %3491 = vst [vmem:[#allocation22_spill] sm:$0xff] %v3093_v26 }
  0xb6   : > { %2113 = vmatprep.mubr.f32.mxu0 %v326_v28  ;;  %v2908_v28 = vld [vmem:[%s2803_s27 + $0x20] sm:$0xff]  ;;  %2153 = vmatprep.subr.mxu0 %v932_v27 }
  0xb7   : > { %2154 = vmatpush3.msra.mxu0 %v932_v27  ;;  %v3096_v27 = vld [vmem:[%s2803_s27 + $0x1a8] sm:$0xff] }
  0xb8   : > { %3492 = vst [vmem:[#allocation23_spill] sm:$0xff] %v3096_v27 }
  0xb9   : > { %2114 = vmatmul.mubr.f32.gmra.mxu0 %v327_v29  ;;  %v2911_v29 = vld [vmem:[%s2803_s27 + $0x38] sm:$0xff] }
  0xba   : > { %2116 = vmatprep.mubr.f32.mxu0 %v328_v30  ;;  %v931_v30 = vld [vmem:[#allocation8 + $0xc8] sm:$0xff] }
  0xbb   : > { %2155 = vmatprep.subr.mxu0 %v931_v30 }
  0xbc   : > { %2156 = vmatpush3.msra.mxu0 %v931_v30  ;;  %v3101_v30 = vld [vmem:[%s2803_s27 + $0x1a0] sm:$0xff] }
  0xbd   : > { %2117 = vmatmul.mubr.f32.gmra.mxu0 %v329_v31  ;;  %v930_v31 = vld [vmem:[#allocation8 + $0xc0] sm:$0xff]  ;;  %3493 = vst [vmem:[#allocation24_spill] sm:$0xff] %v3101_v30 }
  0xbe   : > { %2119 = vmatprep.mubr.f32.mxu0 %v330_v32  ;;  %v2916_v32 = vld [vmem:[%s2803_s27 + $0x30] sm:$0xff]  ;;  %2157 = vmatprep.subr.mxu0 %v930_v31 }
  0xbf   : > { %2158 = vmatpush3.msra.mxu0 %v930_v31  ;;  %v3104_v31 = vld [vmem:[%s2803_s27 + $0x1b8] sm:$0xff] }
  0xc0   : > { %3494 = vst [vmem:[#allocation25_spill] sm:$0xff] %v3104_v31 }
  0xc1   : > { %2120 = vmatmul.mubr.f32.gmra.mxu0 %v331_v33  ;;  %v2919_v33 = vld [vmem:[%s2803_s27 + $0x48] sm:$0xff] }
  0xc2   : > { %2122 = vmatprep.mubr.f32.mxu0 %v332_v34  ;;  %v929_v34 = vld [vmem:[#allocation8 + $0xb8] sm:$0xff] }
  0xc3   : > { %2159 = vmatprep.subr.mxu0 %v929_v34 }
  0xc4   : > { %2160 = vmatpush3.msra.mxu0 %v929_v34  ;;  %v3109_v34 = vld [vmem:[%s2803_s27 + $0x1b0] sm:$0xff] }
  0xc5   : > { %2123 = vmatmul.mubr.f32.gmra.mxu0 %v333_v35  ;;  %v928_v35 = vld [vmem:[#allocation8 + $0xb0] sm:$0xff]  ;;  %3495 = vst [vmem:[#allocation26_spill] sm:$0xff] %v3109_v34 }
  0xc6   : > { %2125 = vmatprep.mubr.f32.mxu0 %v334_v36  ;;  %v2924_v36 = vld [vmem:[%s2803_s27 + $0x40] sm:$0xff]  ;;  %2161 = vmatprep.subr.mxu0 %v928_v35 }
  0xc7   : > { %2162 = vmatpush3.msra.mxu0 %v928_v35  ;;  %v3112_v35 = vld [vmem:[%s2803_s27 + $0x1c8] sm:$0xff] }
  0xc8   : > { %3496 = vst [vmem:[#allocation27_spill] sm:$0xff] %v3112_v35 }
  0xc9   : > { %2126 = vmatmul.mubr.f32.gmra.mxu0 %v335_v37  ;;  %v2927_v37 = vld [vmem:[%s2803_s27 + $0x58] sm:$0xff] }
  0xca   : > { %2128 = vmatprep.mubr.f32.mxu0 %v336_v38  ;;  %v927_v38 = vld [vmem:[#allocation8 + $0xa8] sm:$0xff] }
  0xcb   : > { %2163 = vmatprep.subr.mxu0 %v927_v38 }
  0xcc   : > { %2164 = vmatpush3.msra.mxu0 %v927_v38  ;;  %v3117_v38 = vld [vmem:[%s2803_s27 + $0x1c0] sm:$0xff] }
  0xcd   : > { %2129 = vmatmul.mubr.f32.gmra.mxu0 %v337_v39  ;;  %v926_v39 = vld [vmem:[#allocation8 + $0xa0] sm:$0xff]  ;;  %3497 = vst [vmem:[#allocation28_spill] sm:$0xff] %v3117_v38 }
  0xce   : > { %2131 = vmatprep.mubr.f32.mxu0 %v338_v40  ;;  %v2932_v40 = vld [vmem:[%s2803_s27 + $0x50] sm:$0xff]  ;;  %2165 = vmatprep.subr.mxu0 %v926_v39 }
  0xcf   : > { %2166 = vmatpush3.msra.mxu0 %v926_v39  ;;  %v3120_v39 = vld [vmem:[%s2803_s27 + $0x1d8] sm:$0xff] }
  0xd0   : > { %3498 = vst [vmem:[#allocation29_spill] sm:$0xff] %v3120_v39 }
  0xd1   : > { %2132 = vmatmul.mubr.f32.gmra.mxu0 %v339_v41  ;;  %v2935_v41 = vld [vmem:[%s2803_s27 + $0x68] sm:$0xff] }
  0xd2   : > { %2134 = vmatprep.mubr.f32.mxu0 %v340_v42  ;;  %v2940_v42 = vld [vmem:[%s2803_s27 + $0x60] sm:$0xff] }
  0xd5   : > { %2135 = vmatmul.mubr.f32.gmra.mxu0 %v341_v43  ;;  %v2943_v43 = vld [vmem:[%s2803_s27 + $0x78] sm:$0xff] }
  0xd6   : > { %2137 = vmatprep.mubr.f32.mxu0 %v342_v44  ;;  %v2948_v44 = vld [vmem:[%s2803_s27 + $0x70] sm:$0xff] }
  0xd9   : > { %2138 = vmatmul.mubr.f32.gmra.mxu0 %v343_v45  ;;  %v2951_v45 = vld [vmem:[%s2803_s27 + $0x88] sm:$0xff] }
  0xda   : > { %2140 = vmatprep.mubr.f32.mxu0 %v344_v46  ;;  %v2956_v46 = vld [vmem:[%s2803_s27 + $0x80] sm:$0xff] }
  0xdd   : > { %2141 = vmatmul.mubr.f32.gmra.mxu0 %v345_v47  ;;  %v2959_v47 = vld [vmem:[%s2803_s27 + $0x98] sm:$0xff] }
 0x161   : > { %v2097_v50 = vpop.f32.mrf.mxu0 }
 0x163   : > { %v501_v51 = vpop.f32.mrf.mxu0 }
 0x165   : > { %v2100_v52 = vpop.f32.mrf.mxu0 }
 0x167   : > { %v511_v53 = vpop.f32.mrf.mxu0 }
 0x169   : > { %v2103_v54 = vpop.f32.mrf.mxu0 }
 0x16b   : > { %v521_v55 = vpop.f32.mrf.mxu0 }
 0x16d   : > { %v2106_v56 = vpop.f32.mrf.mxu0 }
 0x16f   : > { %v531_v57 = vpop.f32.mrf.mxu0 }
 0x171   : > { %v2109_v58 = vpop.f32.mrf.mxu0 }
 0x173   : > { %v541_v59 = vpop.f32.mrf.mxu0 }
 0x175   : > { %v2112_v60 = vpop.f32.mrf.mxu0 }
 0x177   : > { %v551_v61 = vpop.f32.mrf.mxu0 }
 0x179   : > { %v2115_v62 = vpop.f32.mrf.mxu0 }
 0x17b   : > { %v561_v63 = vpop.f32.mrf.mxu0 }
 0x17d   : > { %v2118_v0 = vpop.f32.mrf.mxu0 }
 0x17e   : > { %665 = vmatpush1.msra.mxu1 %v2118_v0  ;;  %v3020_v0 = vld [vmem:[%s2803_s27 + $0x100] sm:$0xff] }
 0x17f   : > { %v571_v1 = vpop.f32.mrf.mxu0  ;;  %666 = vmatprep.subr.mxu1 %v3439_v48 }
 0x180   : > { %667 = vmatpush1.msra.mxu1 %v571_v1  ;;  %v3023_v1 = vld [vmem:[%s2803_s27 + $0x118] sm:$0xff] }
 0x181   : > { %v2855_v2 = vpop.f32.mrf.mxu0  ;;  %668 = vmatprep.subr.mxu1 %v3439_v48 }
 0x182   : > { %669 = vmatpush1.msra.mxu1 %v2115_v62  ;;  %v3012_v62 = vld [vmem:[%s2803_s27 + $0xf0] sm:$0xff] }
 0x183   : > { %v2858_v3 = vpop.f32.mrf.mxu0  ;;  %670 = vmatprep.subr.mxu1 %v3439_v48 }
 0x184   : > { %671 = vmatpush1.msra.mxu1 %v561_v63  ;;  %v3015_v63 = vld [vmem:[%s2803_s27 + $0x108] sm:$0xff] }
 0x185   : > { %v2124_v4 = vpop.f32.mrf.mxu0  ;;  %672 = vmatprep.subr.mxu1 %v3439_v48 }
 0x186   : > { %673 = vmatpush1.msra.mxu1 %v2112_v60  ;;  %v3004_v60 = vld [vmem:[%s2803_s27 + $0xe0] sm:$0xff] }
 0x187   : > { %v591_v5 = vpop.f32.mrf.mxu0  ;;  %674 = vmatprep.subr.mxu1 %v3439_v48 }
 0x188   : > { %675 = vmatpush1.msra.mxu1 %v551_v61  ;;  %v3007_v61 = vld [vmem:[%s2803_s27 + $0xf8] sm:$0xff] }
 0x189   : > { %v2127_v6 = vpop.f32.mrf.mxu0  ;;  %676 = vmatprep.subr.mxu1 %v3439_v48 }
 0x18a   : > { %677 = vmatpush1.msra.mxu1 %v2109_v58  ;;  %v2996_v58 = vld [vmem:[%s2803_s27 + $0xd0] sm:$0xff] }
 0x18b   : > { %v601_v7 = vpop.f32.mrf.mxu0  ;;  %678 = vmatprep.subr.mxu1 %v3439_v48 }
 0x18c   : > { %679 = vmatpush1.msra.mxu1 %v541_v59  ;;  %v2999_v59 = vld [vmem:[%s2803_s27 + $0xe8] sm:$0xff] }
 0x18d   : > { %v2130_v8 = vpop.f32.mrf.mxu0  ;;  %680 = vmatprep.subr.mxu1 %v3439_v48 }
 0x18e   : > { %681 = vmatpush1.msra.mxu1 %v2106_v56  ;;  %v2988_v56 = vld [vmem:[%s2803_s27 + $0xc0] sm:$0xff] }
 0x18f   : > { %v611_v9 = vpop.f32.mrf.mxu0  ;;  %682 = vmatprep.subr.mxu1 %v3439_v48 }
 0x190   : > { %683 = vmatpush1.msra.mxu1 %v531_v57  ;;  %v2991_v57 = vld [vmem:[%s2803_s27 + $0xd8] sm:$0xff] }
 0x191   : > { %v2133_v10 = vpop.f32.mrf.mxu0  ;;  %684 = vmatprep.subr.mxu1 %v3439_v48 }
 0x192   : > { %685 = vmatpush1.msra.mxu1 %v2103_v54  ;;  %v2980_v54 = vld [vmem:[%s2803_s27 + $0xb0] sm:$0xff] }
 0x193   : > { %v621_v11 = vpop.f32.mrf.mxu0  ;;  %686 = vmatprep.subr.mxu1 %v3439_v48 }
 0x194   : > { %687 = vmatpush1.msra.mxu1 %v521_v55  ;;  %v2983_v55 = vld [vmem:[%s2803_s27 + $0xc8] sm:$0xff] }
 0x195   : > { %v2136_v12 = vpop.f32.mrf.mxu0  ;;  %688 = vmatprep.subr.mxu1 %v3439_v48 }
 0x196   : > { %689 = vmatpush1.msra.mxu1 %v2100_v52  ;;  %v2972_v52 = vld [vmem:[%s2803_s27 + $0xa0] sm:$0xff] }
 0x197   : > { %v631_v13 = vpop.f32.mrf.mxu0  ;;  %690 = vmatprep.subr.mxu1 %v3439_v48 }
 0x198   : > { %691 = vmatpush1.msra.mxu1 %v511_v53  ;;  %v2975_v53 = vld [vmem:[%s2803_s27 + $0xb8] sm:$0xff] }
 0x199   : > { %v2139_v14 = vpop.f32.mrf.mxu0  ;;  %692 = vmatprep.subr.mxu1 %v3439_v48 }
 0x19a   : > { %693 = vmatpush1.msra.mxu1 %v2097_v50  ;;  %v2964_v50 = vld [vmem:[%s2803_s27 + $0x90] sm:$0xff] }
 0x19b   : > { %v641_v15 = vpop.f32.mrf.mxu0  ;;  %694 = vmatprep.subr.mxu1 %v3439_v48 }
 0x19c   : > { %695 = vmatpush1.msra.mxu1 %v501_v51  ;;  %v2967_v51 = vld [vmem:[%s2803_s27 + $0xa8] sm:$0xff] }
 0x19d   : > { %v2142_v16 = vpop.f32.mrf.mxu0  ;;  %696 = vmatprep.subr.mxu1 %v3439_v48 }
 0x19e   : > { %697 = vmatpush2.msra.mxu1 %v2142_v16  ;;  %v3069_v16 = vld [vmem:[%s2803_s27 + $0x160] sm:$0xff] }
 0x19f   : > { %v651_v17 = vpop.f32.mrf.mxu0  ;;  %698 = vmatprep.subr.mxu1 %v3439_v48  ;;  %3485 = vst [vmem:[#allocation16_spill] sm:$0xff] %v3069_v16 }
 0x1a0   : > { %699 = vmatpush2.msra.mxu1 %v651_v17  ;;  %v3072_v17 = vld [vmem:[%s2803_s27 + $0x178] sm:$0xff] }
 0x1a1   : > { %700 = vmatprep.subr.mxu1 %v3439_v48  ;;  %3486 = vst [vmem:[#allocation17_spill] sm:$0xff] %v3072_v17 }
 0x1a2   : > { %701 = vmatpush2.msra.mxu1 %v2139_v14  ;;  %v3061_v14 = vld [vmem:[%s2803_s27 + $0x150] sm:$0xff] }
 0x1a3   : > { %702 = vmatprep.subr.mxu1 %v3439_v48 }
 0x1a4   : > { %703 = vmatpush2.msra.mxu1 %v641_v15  ;;  %v3064_v15 = vld [vmem:[%s2803_s27 + $0x168] sm:$0xff] }
 0x1a5   : > { %704 = vmatprep.subr.mxu1 %v3439_v48 }
 0x1a6   : > { %705 = vmatpush2.msra.mxu1 %v2136_v12  ;;  %v3053_v12 = vld [vmem:[%s2803_s27 + $0x140] sm:$0xff] }
 0x1a7   : > { %706 = vmatprep.subr.mxu1 %v3439_v48 }
 0x1a8   : > { %707 = vmatpush2.msra.mxu1 %v631_v13  ;;  %v3056_v13 = vld [vmem:[%s2803_s27 + $0x158] sm:$0xff] }
 0x1a9   : > { %708 = vmatprep.subr.mxu1 %v3439_v48 }
 0x1aa   : > { %709 = vmatpush2.msra.mxu1 %v2133_v10  ;;  %v3044_v10 = vld [vmem:[%s2803_s27 + $0x130] sm:$0xff] }
 0x1ab   : > { %710 = vmatprep.subr.mxu1 %v3439_v48 }
 0x1ac   : > { %711 = vmatpush2.msra.mxu1 %v621_v11  ;;  %v3048_v11 = vld [vmem:[%s2803_s27 + $0x148] sm:$0xff] }
 0x1ad   : > { %712 = vmatprep.subr.mxu1 %v3439_v48 }
 0x1ae   : > { %713 = vmatpush2.msra.mxu1 %v2130_v8  ;;  %v3039_v8 = vld [vmem:[%s2803_s27 + $0x138] sm:$0xff] }
 0x1af   : > { %714 = vmatprep.subr.mxu1 %v3439_v48 }
 0x1b0   : > { %715 = vmatpush2.msra.mxu1 %v611_v9  ;;  %v922_v9 = vld [vmem:[#allocation8 + $0x80] sm:$0xff] }
 0x1b1   : > { %716 = vmatprep.subr.mxu1 %v3439_v48 }
 0x1b2   : > { %717 = vmatpush2.msra.mxu1 %v2127_v6  ;;  %v923_v6 = vld [vmem:[#allocation8 + $0x88] sm:$0xff] }
 0x1b3   : > { %718 = vmatprep.subr.mxu1 %v3439_v48 }
 0x1b4   : > { %719 = vmatpush2.msra.mxu1 %v601_v7  ;;  %v3036_v7 = vld [vmem:[%s2803_s27 + $0x120] sm:$0xff] }
 0x1b5   : > { %720 = vmatprep.subr.mxu1 %v3439_v48 }
 0x1b6   : > { %721 = vmatpush2.msra.mxu1 %v2124_v4  ;;  %v3031_v4 = vld [vmem:[%s2803_s27 + $0x128] sm:$0xff] }
 0x1b7   : > { %722 = vmatprep.subr.mxu1 %v3439_v48 }
 0x1b8   : > { %723 = vmatpush2.msra.mxu1 %v591_v5  ;;  %v924_v5 = vld [vmem:[#allocation8 + $0x90] sm:$0xff] }
 0x1b9   : > { %724 = vmatprep.subr.mxu1 %v3439_v48 }
 0x1ba   : > { %725 = vmatpush2.msra.mxu1 %v2855_v2  ;;  %v925_v2 = vld [vmem:[#allocation8 + $0x98] sm:$0xff] }
 0x1bb   : > { %726 = vmatprep.subr.mxu1 %v3439_v48  ;;  %2167 = vmatprep.subr.mxu0 %v925_v2 }
 0x1bc   : > { %727 = vmatpush2.msra.mxu1 %v2858_v3  ;;  %v3028_v3 = vld [vmem:[%s2803_s27 + $0x110] sm:$0xff]  ;;  %2168 = vmatpush3.msra.mxu0 %v925_v2 }
 0x1bd   : > { %729 = vmatmul.mubr.f32.vlgmr.msra.gmra.mxu1 %v2890_v20  ;;  %2169 = vmatprep.subr.mxu0 %v924_v5  ;;  %v3125_v2 = vld [vmem:[%s2803_s27 + $0x1d0] sm:$0xff] }
 0x1be   : > { %733 = vmatprep.mubr.f32.mxu1 %v2894_v21  ;;  %2170 = vmatpush3.msra.mxu0 %v924_v5  ;;  %3499 = vst [vmem:[#allocation30_spill] sm:$0xff] %v3125_v2  ;;  %v3128_v5 = vld [vmem:[%s2803_s27 + $0x1e8] sm:$0xff] }
 0x1bf   : > { %2171 = vmatprep.subr.mxu0 %v923_v6  ;;  %3500 = vst [vmem:[#allocation31_spill] sm:$0xff] %v3128_v5 }
 0x1c0   : > { %2172 = vmatpush3.msra.mxu0 %v923_v6  ;;  %v3133_v6 = vld [vmem:[%s2803_s27 + $0x1e0] sm:$0xff] }
 0x1c1   : > { %734 = vmatmul.mubr.f32.gmra.mxu1 %v2900_v24  ;;  %2173 = vmatprep.subr.mxu0 %v922_v9  ;;  %3501 = vst [vmem:[#allocation32_spill] sm:$0xff] %v3133_v6 }
 0x1c2   : > { %738 = vmatprep.mubr.f32.mxu1 %v2903_v25  ;;  %2174 = vmatpush3.msra.mxu0 %v922_v9  ;;  %v3136_v9 = vld [vmem:[%s2803_s27 + $0x1f8] sm:$0xff] }
 0x1c3   : > { %1167 = vmatprep.subr.mxu0 %v3439_v48  ;;  %3502 = vst [vmem:[#allocation33_spill] sm:$0xff] %v3136_v9  ;;  %v3141_v48 = vld [vmem:[%s2803_s27 + $0x1f0] sm:$0xff] }
 0x1c4   : > { %3503 = vst [vmem:[#allocation34_spill] sm:$0xff] %v3141_v48 }
 0x1c5   : > { %739 = vmatmul.mubr.f32.gmra.mxu1 %v2908_v28 }
 0x1c6   : > { %743 = vmatprep.mubr.f32.mxu1 %v2911_v29 }
 0x1c9   : > { %744 = vmatmul.mubr.f32.gmra.mxu1 %v2916_v32 }
 0x1ca   : > { %748 = vmatprep.mubr.f32.mxu1 %v2919_v33 }
 0x1cd   : > { %749 = vmatmul.mubr.f32.gmra.mxu1 %v2924_v36 }
 0x1ce   : > { %753 = vmatprep.mubr.f32.mxu1 %v2927_v37 }
 0x1d1   : > { %754 = vmatmul.mubr.f32.gmra.mxu1 %v2932_v40 }
 0x1d2   : > { %758 = vmatprep.mubr.f32.mxu1 %v2935_v41 }
 0x1d5   : > { %759 = vmatmul.mubr.f32.gmra.mxu1 %v2940_v42 }
 0x1d6   : > { %763 = vmatprep.mubr.f32.mxu1 %v2943_v43 }
 0x1d9   : > { %764 = vmatmul.mubr.f32.gmra.mxu1 %v2948_v44 }
 0x1da   : > { %768 = vmatprep.mubr.f32.mxu1 %v2951_v45 }
 0x1dd   : > { %769 = vmatmul.mubr.f32.gmra.mxu1 %v2956_v46 }
 0x1de   : > { %773 = vmatprep.mubr.f32.mxu1 %v2959_v47 }
 0x1e1   : > { %774 = vmatmul.mubr.f32.gmra.mxu1 %v2964_v50 }
 0x1e2   : > { %778 = vmatprep.mubr.f32.mxu1 %v2967_v51 }
 0x1e5   : > { %779 = vmatmul.mubr.f32.gmra.mxu1 %v2972_v52 }
 0x1e6   : > { %783 = vmatprep.mubr.f32.mxu1 %v2975_v53 }
 0x1e9   : > { %784 = vmatmul.mubr.f32.gmra.mxu1 %v2980_v54 }
 0x1ea   : > { %788 = vmatprep.mubr.f32.mxu1 %v2983_v55 }
 0x1ed   : > { %789 = vmatmul.mubr.f32.gmra.mxu1 %v2988_v56 }
 0x1ee   : > { %793 = vmatprep.mubr.f32.mxu1 %v2991_v57 }
 0x1f1   : > { %794 = vmatmul.mubr.f32.gmra.mxu1 %v2996_v58 }
 0x1f2   : > { %798 = vmatprep.mubr.f32.mxu1 %v2999_v59 }
 0x1f5   : > { %799 = vmatmul.mubr.f32.gmra.mxu1 %v3004_v60 }
 0x1f6   : > { %803 = vmatprep.mubr.f32.mxu1 %v3007_v61 }
 0x1f9   : > { %804 = vmatmul.mubr.f32.gmra.mxu1 %v3012_v62 }
 0x1fa   : > { %808 = vmatprep.mubr.f32.mxu1 %v3015_v63 }
 0x1fd   : > { %809 = vmatmul.mubr.f32.gmra.mxu1 %v3020_v0 }
 0x1fe   : > { %813 = vmatprep.mubr.f32.mxu1 %v3023_v1 }
 0x201   : > { %814 = vmatmul.mubr.f32.gmra.mxu1 %v3028_v3 }
 0x202   : > { %818 = vmatprep.mubr.f32.mxu1 %v3031_v4 }
 0x205   : > { %819 = vmatmul.mubr.f32.gmra.mxu1 %v3036_v7 }
 0x206   : > { %823 = vmatprep.mubr.f32.mxu1 %v3039_v8 }
 0x209   : > { %824 = vmatmul.mubr.f32.gmra.mxu1 %v3044_v10 }
 0x20a   : > { %828 = vmatprep.mubr.f32.mxu1 %v3048_v11 }
 0x20d   : > { %829 = vmatmul.mubr.f32.gmra.mxu1 %v3053_v12 }
 0x20e   : > { %833 = vmatprep.mubr.f32.mxu1 %v3056_v13 }
 0x211   : > { %834 = vmatmul.mubr.f32.gmra.mxu1 %v3061_v14 }
 0x212   : > { %838 = vmatprep.mubr.f32.mxu1 %v3064_v15 }
 0x215   : > { %839 = vmatmul.mubr.f32.gmra.mxu1 %v3069_v16 }
 0x216   : > { %843 = vmatprep.mubr.f32.mxu1 %v3072_v17 }
 0x219   : > { %844 = vmatmul.mubr.f32.gmra.mxu1 %v3077_v18 }
 0x21a   : > { %848 = vmatprep.mubr.f32.mxu1 %v3080_v19 }
 0x21d   : > { %849 = vmatmul.mubr.f32.gmra.mxu1 %v3085_v22 }
 0x21e   : > { %853 = vmatprep.mubr.f32.mxu1 %v3088_v23 }
 0x221   : > { %854 = vmatmul.mubr.f32.gmra.mxu1 %v3093_v26 }
 0x222   : > { %858 = vmatprep.mubr.f32.mxu1 %v3096_v27 }
 0x225   : > { %859 = vmatmul.mubr.f32.gmra.mxu1 %v3101_v30 }
 0x226   : > { %863 = vmatprep.mubr.f32.mxu1 %v3104_v31 }
 0x229   : > { %864 = vmatmul.mubr.f32.gmra.mxu1 %v3109_v34 }
 0x22a   : > { %868 = vmatprep.mubr.f32.mxu1 %v3112_v35 }
 0x22d   : > { %869 = vmatmul.mubr.f32.gmra.mxu1 %v3117_v38 }
 0x22e   : > { %873 = vmatprep.mubr.f32.mxu1 %v3120_v39  ;;  %v660_v39 = vlaneseq }
 0x230   : > { %v3144_v38 = vshrl.u32 %v660_v39, 7 }
 0x231   : > { %874 = vmatmul.mubr.f32.gmra.mxu1 %v3125_v2 }
 0x232   : > { %878 = vmatprep.mubr.f32.mxu1 %v3128_v5  ;;  %3504 = vst [vmem:[#allocation35_spill] sm:$0xff] %v3144_v38  ;;  %v662_v35 = vsub.s32 0, %v3144_v38  ;;  %v3150_v5 = vld [vmem:[%s3431_s4] sm:$0xf] }
 0x233   : > { %3505 = vst [vmem:[#allocation36_spill] sm:$0xff] %v3150_v5 }
 0x234   : > { %v3153_v2 = vrot.slane %v3150_v5, %v662_v35 }
 0x235   : > { %879 = vmatmul.mubr.f32.gmra.mxu1 %v3133_v6 }
 0x236   : > { %883 = vmatprep.mubr.f32.mxu1 %v3136_v9 }
 0x239   : > { %884 = vmatmul.mubr.f32.gmra.mxu1 %v3141_v48 }
 0x27d   : > { %v730_v6 = vpop.f32.mrf.mxu1 }
 0x27e   : > { %v731_v9 = vadd.f32 %v730_v6, %v3153_v2 }
 0x27f   : > { %v732_v34 = vpop.f32.mrf.mxu1 }
 0x280   : > { %v889_v31 = vmax.f32 %v731_v9, 0.0 }
 0x281   : > { %v735_v30 = vpop.f32.mrf.mxu1 }
 0x282   : > { %v736_v48 = vadd.f32 %v735_v30, %v3153_v2  ;;  %2175 = vmatprep.mubr.f32.mxu0 %v889_v31 }
 0x283   : > { %v737_v39 = vpop.f32.mrf.mxu1 }
 0x284   : > { %v890_v27 = vmax.f32 %v736_v48, 0.0 }
 0x285   : > { %v740_v38 = vpop.f32.mrf.mxu1 }
 0x286   : > { %v741_v26 = vadd.f32 %v740_v38, %v3153_v2  ;;  %2176 = vmatmul.mubr.f32.vlgmr.msra.gmra.mxu0 %v890_v27 }
 0x287   : > { %v742_v23 = vpop.f32.mrf.mxu1 }
 0x288   : > { %v891_v22 = vmax.f32 %v741_v26, 0.0 }
 0x289   : > { %v745_v19 = vpop.f32.mrf.mxu1 }
 0x28a   : > { %v746_v35 = vadd.f32 %v745_v19, %v3153_v2  ;;  %2178 = vmatprep.mubr.f32.mxu0 %v891_v22 }
 0x28b   : > { %v747_v5 = vpop.f32.mrf.mxu1 }
 0x28c   : > { %v892_v6 = vmax.f32 %v746_v35, 0.0 }
 0x28d   : > { %v750_v34 = vpop.f32.mrf.mxu1 }
 0x28e   : > { %v751_v9 = vadd.f32 %v750_v34, %v3153_v2  ;;  %2179 = vmatmul.mubr.f32.gmra.mxu0 %v892_v6 }
 0x28f   : > { %v752_v30 = vpop.f32.mrf.mxu1 }
 0x290   : > { %v893_v31 = vmax.f32 %v751_v9, 0.0 }
 0x291   : > { %v755_v39 = vpop.f32.mrf.mxu1 }
 0x292   : > { %v756_v48 = vadd.f32 %v755_v39, %v3153_v2  ;;  %2181 = vmatprep.mubr.f32.mxu0 %v893_v31 }
 0x293   : > { %v757_v38 = vpop.f32.mrf.mxu1 }
 0x294   : > { %v894_v27 = vmax.f32 %v756_v48, 0.0 }
 0x295   : > { %v760_v23 = vpop.f32.mrf.mxu1 }
 0x296   : > { %v761_v26 = vadd.f32 %v760_v23, %v3153_v2  ;;  %2182 = vmatmul.mubr.f32.gmra.mxu0 %v894_v27 }
 0x297   : > { %v762_v19 = vpop.f32.mrf.mxu1 }
 0x298   : > { %v895_v22 = vmax.f32 %v761_v26, 0.0 }
 0x299   : > { %v765_v5 = vpop.f32.mrf.mxu1 }
 0x29a   : > { %v766_v35 = vadd.f32 %v765_v5, %v3153_v2  ;;  %2184 = vmatprep.mubr.f32.mxu0 %v895_v22 }
 0x29b   : > { %v767_v34 = vpop.f32.mrf.mxu1 }
 0x29c   : > { %v896_v6 = vmax.f32 %v766_v35, 0.0 }
 0x29d   : > { %v770_v30 = vpop.f32.mrf.mxu1 }
 0x29e   : > { %v771_v9 = vadd.f32 %v770_v30, %v3153_v2  ;;  %2185 = vmatmul.mubr.f32.gmra.mxu0 %v896_v6 }
 0x29f   : > { %v772_v39 = vpop.f32.mrf.mxu1 }
 0x2a0   : > { %v897_v31 = vmax.f32 %v771_v9, 0.0 }
 0x2a1   : > { %v775_v38 = vpop.f32.mrf.mxu1 }
 0x2a2   : > { %v776_v48 = vadd.f32 %v775_v38, %v3153_v2  ;;  %2187 = vmatprep.mubr.f32.mxu0 %v897_v31 }
 0x2a3   : > { %v777_v23 = vpop.f32.mrf.mxu1 }
 0x2a4   : > { %v898_v27 = vmax.f32 %v776_v48, 0.0 }
 0x2a5   : > { %v780_v19 = vpop.f32.mrf.mxu1 }
 0x2a6   : > { %v781_v26 = vadd.f32 %v780_v19, %v3153_v2  ;;  %2188 = vmatmul.mubr.f32.gmra.mxu0 %v898_v27 }
 0x2a7   : > { %v782_v5 = vpop.f32.mrf.mxu1 }
 0x2a8   : > { %v899_v22 = vmax.f32 %v781_v26, 0.0 }
 0x2a9   : > { %v785_v34 = vpop.f32.mrf.mxu1 }
 0x2aa   : > { %v786_v35 = vadd.f32 %v785_v34, %v3153_v2  ;;  %2190 = vmatprep.mubr.f32.mxu0 %v899_v22 }
 0x2ab   : > { %v787_v30 = vpop.f32.mrf.mxu1 }
 0x2ac   : > { %v900_v6 = vmax.f32 %v786_v35, 0.0 }
 0x2ad   : > { %v790_v39 = vpop.f32.mrf.mxu1 }
 0x2ae   : > { %v791_v9 = vadd.f32 %v790_v39, %v3153_v2  ;;  %2191 = vmatmul.mubr.f32.gmra.mxu0 %v900_v6 }
 0x2af   : > { %v792_v38 = vpop.f32.mrf.mxu1 }
 0x2b0   : > { %v901_v31 = vmax.f32 %v791_v9, 0.0 }
 0x2b1   : > { %v795_v23 = vpop.f32.mrf.mxu1 }
 0x2b2   : > { %v796_v48 = vadd.f32 %v795_v23, %v3153_v2  ;;  %2193 = vmatprep.mubr.f32.mxu0 %v901_v31 }
 0x2b3   : > { %v797_v19 = vpop.f32.mrf.mxu1 }
 0x2b4   : > { %v902_v27 = vmax.f32 %v796_v48, 0.0 }
 0x2b5   : > { %v800_v5 = vpop.f32.mrf.mxu1 }
 0x2b6   : > { %v801_v26 = vadd.f32 %v800_v5, %v3153_v2  ;;  %2194 = vmatmul.mubr.f32.gmra.mxu0 %v902_v27 }
 0x2b7   : > { %v802_v34 = vpop.f32.mrf.mxu1 }
 0x2b8   : > { %v903_v22 = vmax.f32 %v801_v26, 0.0 }
 0x2b9   : > { %v805_v30 = vpop.f32.mrf.mxu1 }
 0x2ba   : > { %v806_v35 = vadd.f32 %v805_v30, %v3153_v2  ;;  %2196 = vmatprep.mubr.f32.mxu0 %v903_v22 }
 0x2bb   : > { %v807_v39 = vpop.f32.mrf.mxu1 }
 0x2bc   : > { %v904_v6 = vmax.f32 %v806_v35, 0.0 }
 0x2bd   : > { %v810_v38 = vpop.f32.mrf.mxu1 }
 0x2be   : > { %v811_v9 = vadd.f32 %v810_v38, %v3153_v2  ;;  %2197 = vmatmul.mubr.f32.gmra.mxu0 %v904_v6 }
 0x2bf   : > { %v812_v23 = vpop.f32.mrf.mxu1 }
 0x2c0   : > { %v905_v31 = vmax.f32 %v811_v9, 0.0 }
 0x2c1   : > { %v815_v19 = vpop.f32.mrf.mxu1 }
 0x2c2   : > { %v816_v48 = vadd.f32 %v815_v19, %v3153_v2  ;;  %2199 = vmatprep.mubr.f32.mxu0 %v905_v31 }
 0x2c3   : > { %v817_v5 = vpop.f32.mrf.mxu1 }
 0x2c4   : > { %v906_v27 = vmax.f32 %v816_v48, 0.0 }
 0x2c5   : > { %v820_v34 = vpop.f32.mrf.mxu1 }
 0x2c6   : > { %v821_v26 = vadd.f32 %v820_v34, %v3153_v2  ;;  %2200 = vmatmul.mubr.f32.gmra.mxu0 %v906_v27 }
 0x2c7   : > { %v822_v30 = vpop.f32.mrf.mxu1 }
 0x2c8   : > { %v907_v22 = vmax.f32 %v821_v26, 0.0 }
 0x2c9   : > { %v825_v39 = vpop.f32.mrf.mxu1 }
 0x2ca   : > { %v826_v35 = vadd.f32 %v825_v39, %v3153_v2  ;;  %2202 = vmatprep.mubr.f32.mxu0 %v907_v22 }
 0x2cb   : > { %v827_v38 = vpop.f32.mrf.mxu1 }
 0x2cc   : > { %v908_v6 = vmax.f32 %v826_v35, 0.0 }
 0x2cd   : > { %v830_v23 = vpop.f32.mrf.mxu1 }
 0x2ce   : > { %v831_v9 = vadd.f32 %v830_v23, %v3153_v2  ;;  %2203 = vmatmul.mubr.f32.gmra.mxu0 %v908_v6 }
 0x2cf   : > { %v832_v19 = vpop.f32.mrf.mxu1 }
 0x2d0   : > { %v909_v31 = vmax.f32 %v831_v9, 0.0 }
 0x2d1   : > { %v835_v5 = vpop.f32.mrf.mxu1 }
 0x2d2   : > { %v836_v48 = vadd.f32 %v835_v5, %v3153_v2  ;;  %2205 = vmatprep.mubr.f32.mxu0 %v909_v31 }
 0x2d3   : > { %v837_v34 = vpop.f32.mrf.mxu1 }
 0x2d4   : > { %v910_v27 = vmax.f32 %v836_v48, 0.0 }
 0x2d5   : > { %v840_v30 = vpop.f32.mrf.mxu1 }
 0x2d6   : > { %v841_v26 = vadd.f32 %v840_v30, %v3153_v2  ;;  %2206 = vmatmul.mubr.f32.gmra.mxu0 %v910_v27 }
 0x2d7   : > { %v842_v39 = vpop.f32.mrf.mxu1 }
 0x2d8   : > { %v911_v22 = vmax.f32 %v841_v26, 0.0 }
 0x2d9   : > { %v845_v38 = vpop.f32.mrf.mxu1 }
 0x2da   : > { %v846_v35 = vadd.f32 %v845_v38, %v3153_v2  ;;  %2208 = vmatprep.mubr.f32.mxu0 %v911_v22 }
 0x2db   : > { %v847_v23 = vpop.f32.mrf.mxu1 }
 0x2dc   : > { %v912_v6 = vmax.f32 %v846_v35, 0.0 }
 0x2dd   : > { %v850_v19 = vpop.f32.mrf.mxu1 }
 0x2de   : > { %v851_v9 = vadd.f32 %v850_v19, %v3153_v2  ;;  %2209 = vmatmul.mubr.f32.gmra.mxu0 %v912_v6 }
 0x2df   : > { %v852_v5 = vpop.f32.mrf.mxu1 }
 0x2e0   : > { %v913_v31 = vmax.f32 %v851_v9, 0.0 }
 0x2e1   : > { %v855_v34 = vpop.f32.mrf.mxu1 }
 0x2e2   : > { %v856_v48 = vadd.f32 %v855_v34, %v3153_v2  ;;  %2211 = vmatprep.mubr.f32.mxu0 %v913_v31 }
 0x2e3   : > { %v857_v30 = vpop.f32.mrf.mxu1 }
 0x2e4   : > { %v914_v27 = vmax.f32 %v856_v48, 0.0 }
 0x2e5   : > { %v860_v39 = vpop.f32.mrf.mxu1 }
 0x2e6   : > { %v861_v26 = vadd.f32 %v860_v39, %v3153_v2  ;;  %2212 = vmatmul.mubr.f32.gmra.mxu0 %v914_v27 }
 0x2e7   : > { %v862_v38 = vpop.f32.mrf.mxu1 }
 0x2e8   : > { %v915_v22 = vmax.f32 %v861_v26, 0.0 }
 0x2e9   : > { %v865_v23 = vpop.f32.mrf.mxu1 }
 0x2ea   : > { %v866_v35 = vadd.f32 %v865_v23, %v3153_v2  ;;  %2214 = vmatprep.mubr.f32.mxu0 %v915_v22 }
 0x2eb   : > { %v867_v19 = vpop.f32.mrf.mxu1 }
 0x2ec   : > { %v916_v6 = vmax.f32 %v866_v35, 0.0 }
 0x2ed   : > { %v870_v5 = vpop.f32.mrf.mxu1 }
 0x2ee   : > { %v871_v9 = vadd.f32 %v870_v5, %v3153_v2  ;;  %2215 = vmatmul.mubr.f32.gmra.mxu0 %v916_v6 }
 0x2ef   : > { %v872_v34 = vpop.f32.mrf.mxu1 }
 0x2f0   : > { %v917_v31 = vmax.f32 %v871_v9, 0.0 }
 0x2f1   : > { %v875_v30 = vpop.f32.mrf.mxu1 }
 0x2f2   : > { %v876_v48 = vadd.f32 %v875_v30, %v3153_v2  ;;  %2217 = vmatprep.mubr.f32.mxu0 %v917_v31 }
 0x2f3   : > { %v877_v39 = vpop.f32.mrf.mxu1 }
 0x2f4   : > { %v918_v27 = vmax.f32 %v876_v48, 0.0 }
 0x2f5   : > { %v880_v38 = vpop.f32.mrf.mxu1 }
 0x2f6   : > { %v881_v26 = vadd.f32 %v880_v38, %v3153_v2  ;;  %2218 = vmatmul.mubr.f32.gmra.mxu0 %v918_v27 }
 0x2f7   : > { %v882_v23 = vpop.f32.mrf.mxu1 }
 0x2f8   : > { %v919_v22 = vmax.f32 %v881_v26, 0.0 }
 0x2f9   : > { %v885_v19 = vpop.f32.mrf.mxu1 }
 0x2fa   : > { %v886_v35 = vadd.f32 %v885_v19, %v3153_v2  ;;  %2220 = vmatprep.mubr.f32.mxu0 %v919_v22 }
 0x2fb   : > { %v887_v5 = vpop.f32.mrf.mxu1 }
 0x2fc   : > { %v920_v6 = vmax.f32 %v886_v35, 0.0  ;;  %v3506_v35 = vmov 0.0  }
 0x2fe   : > { %2221 = vmatmul.mubr.f32.gmra.mxu0 %v920_v6 }
 0x2ff   : > { %1231 = vmatprep.mubr.f32.mxu0 %v2851_v49 }
 0x346   : > { %v2177_v9 = vpop.f32.mrf.mxu0 }
 0x348   : > { %v1004_v34 = vpop.f32.mrf.mxu0 }
 0x34e   : > { %v2180_v31 = vpop.f32.mrf.mxu0 }
 0x350   : > { %v1014_v30 = vpop.f32.mrf.mxu0 }
 0x356   : > { %v2183_v48 = vpop.f32.mrf.mxu0 }
 0x358   : > { %v1024_v39 = vpop.f32.mrf.mxu0 }
 0x35e   : > { %v2186_v18 = vpop.f32.mrf.mxu0 }
 0x360   : > { %v1034_v38 = vpop.f32.mrf.mxu0 }
 0x366   : > { %v2189_v27 = vpop.f32.mrf.mxu0 }
 0x368   : > { %v1044_v23 = vpop.f32.mrf.mxu0 }
 0x36e   : > { %v2192_v26 = vpop.f32.mrf.mxu0 }
 0x370   : > { %v1054_v17 = vpop.f32.mrf.mxu0 }
 0x376   : > { %v2195_v16 = vpop.f32.mrf.mxu0 }
 0x378   : > { %v1064_v2 = vpop.f32.mrf.mxu0 }
 0x37e   : > { %v2198_v22 = vpop.f32.mrf.mxu0 }
 0x37f   : > { %1168 = vmatpush1.msra.mxu0 %v2198_v22 }
 0x380   : > { %v1074_v19 = vpop.f32.mrf.mxu0  ;;  %1169 = vmatprep.subr.mxu0 %v3506_v35 }
 0x381   : > { %1170 = vmatpush1.msra.mxu0 %v1074_v19 }
 0x382   : > { %1171 = vmatprep.subr.mxu0 %v3506_v35 }
 0x383   : > { %1172 = vmatpush1.msra.mxu0 %v2195_v16 }
 0x384   : > { %1173 = vmatprep.subr.mxu0 %v3506_v35 }
 0x385   : > { %1174 = vmatpush1.msra.mxu0 %v1064_v2 }
 0x386   : > { %1175 = vmatprep.subr.mxu0 %v3506_v35  ;;  %v2201_v49 = vpop.f32.mrf.mxu0 }
 0x387   : > { %1176 = vmatpush1.msra.mxu0 %v2192_v26 }
 0x388   : > { %1177 = vmatprep.subr.mxu0 %v3506_v35  ;;  %v1084_v16 = vpop.f32.mrf.mxu0 }
 0x389   : > { %1178 = vmatpush1.msra.mxu0 %v1054_v17 }
 0x38a   : > { %1179 = vmatprep.subr.mxu0 %v3506_v35 }
 0x38b   : > { %1180 = vmatpush1.msra.mxu0 %v2189_v27 }
 0x38c   : > { %1181 = vmatprep.subr.mxu0 %v3506_v35 }
 0x38d   : > { %1182 = vmatpush1.msra.mxu0 %v1044_v23 }
 0x38e   : > { %1183 = vmatprep.subr.mxu0 %v3506_v35  ;;  %v2204_v17 = vpop.f32.mrf.mxu0 }
 0x38f   : > { %1184 = vmatpush1.msra.mxu0 %v2186_v18 }
 0x390   : > { %1185 = vmatprep.subr.mxu0 %v3506_v35  ;;  %v1094_v18 = vpop.f32.mrf.mxu0 }
 0x391   : > { %1186 = vmatpush1.msra.mxu0 %v1034_v38 }
 0x392   : > { %1187 = vmatprep.subr.mxu0 %v3506_v35 }
 0x393   : > { %1188 = vmatpush1.msra.mxu0 %v2183_v48 }
 0x394   : > { %1189 = vmatprep.subr.mxu0 %v3506_v35 }
 0x395   : > { %1190 = vmatpush1.msra.mxu0 %v1024_v39 }
 0x396   : > { %1191 = vmatprep.subr.mxu0 %v3506_v35  ;;  %v2207_v5 = vpop.f32.mrf.mxu0 }
 0x397   : > { %1192 = vmatpush1.msra.mxu0 %v2180_v31 }
 0x398   : > { %1193 = vmatprep.subr.mxu0 %v3506_v35  ;;  %v1104_v6 = vpop.f32.mrf.mxu0 }
 0x399   : > { %1194 = vmatpush1.msra.mxu0 %v1014_v30 }
 0x39a   : > { %1195 = vmatprep.subr.mxu0 %v3506_v35 }
 0x39b   : > { %1196 = vmatpush1.msra.mxu0 %v2177_v9 }
 0x39c   : > { %1197 = vmatprep.subr.mxu0 %v3506_v35 }
 0x39d   : > { %1198 = vmatpush1.msra.mxu0 %v1004_v34 }
 0x39e   : > { %1199 = vmatprep.subr.mxu0 %v3506_v35  ;;  %v2210_v48 = vpop.f32.mrf.mxu0 }
 0x3a0   : > { %v1114_v39 = vpop.f32.mrf.mxu0 }
 0x3a6   : > { %v2213_v38 = vpop.f32.mrf.mxu0 }
 0x3a8   : > { %v1124_v31 = vpop.f32.mrf.mxu0 }
 0x3ae   : > { %v2216_v27 = vpop.f32.mrf.mxu0 }
 0x3b0   : > { %v1134_v23 = vpop.f32.mrf.mxu0 }
 0x3b6   : > { %v2219_v26 = vpop.f32.mrf.mxu0 }
 0x3b8   : > { %v1144_v30 = vpop.f32.mrf.mxu0 }
 0x3be   : > { %v2222_v2 = vpop.f32.mrf.mxu0 }
 0x3bf   : > { %1200 = vmatpush2.msra.mxu0 %v2222_v2 }
 0x3c0   : > { %v1154_v22 = vpop.f32.mrf.mxu0  ;;  %1201 = vmatprep.subr.mxu0 %v3506_v35 }
 0x3c1   : > { %1202 = vmatpush2.msra.mxu0 %v1154_v22 }
 0x3c2   : > { %1203 = vmatprep.subr.mxu0 %v3506_v35 }
 0x3c3   : > { %1204 = vmatpush2.msra.mxu0 %v2219_v26 }
 0x3c4   : > { %1205 = vmatprep.subr.mxu0 %v3506_v35 }
 0x3c5   : > { %1206 = vmatpush2.msra.mxu0 %v1144_v30 }
 0x3c6   : > { %1207 = vmatprep.subr.mxu0 %v3506_v35 }
 0x3c7   : > { %1208 = vmatpush2.msra.mxu0 %v2216_v27 }
 0x3c8   : > { %1209 = vmatprep.subr.mxu0 %v3506_v35 }
 0x3c9   : > { %1210 = vmatpush2.msra.mxu0 %v1134_v23 }
 0x3ca   : > { %1211 = vmatprep.subr.mxu0 %v3506_v35 }
 0x3cb   : > { %1212 = vmatpush2.msra.mxu0 %v2213_v38 }
 0x3cc   : > { %1213 = vmatprep.subr.mxu0 %v3506_v35 }
 0x3cd   : > { %1214 = vmatpush2.msra.mxu0 %v1124_v31 }
 0x3ce   : > { %1215 = vmatprep.subr.mxu0 %v3506_v35 }
 0x3cf   : > { %1216 = vmatpush2.msra.mxu0 %v2210_v48 }
 0x3d0   : > { %1217 = vmatprep.subr.mxu0 %v3506_v35 }
 0x3d1   : > { %1218 = vmatpush2.msra.mxu0 %v1114_v39 }
 0x3d2   : > { %1219 = vmatprep.subr.mxu0 %v3506_v35 }
 0x3d3   : > { %1220 = vmatpush2.msra.mxu0 %v2207_v5 }
 0x3d4   : > { %1221 = vmatprep.subr.mxu0 %v3506_v35 }
 0x3d5   : > { %1222 = vmatpush2.msra.mxu0 %v1104_v6 }
 0x3d6   : > { %1223 = vmatprep.subr.mxu0 %v3506_v35 }
 0x3d7   : > { %1224 = vmatpush2.msra.mxu0 %v2204_v17 }
 0x3d8   : > { %1225 = vmatprep.subr.mxu0 %v3506_v35 }
 0x3d9   : > { %1226 = vmatpush2.msra.mxu0 %v1094_v18 }
 0x3da   : > { %1227 = vmatprep.subr.mxu0 %v3506_v35 }
 0x3db   : > { %1228 = vmatpush2.msra.mxu0 %v2201_v49 }
 0x3dc   : > { %1229 = vmatprep.subr.mxu0 %v3506_v35 }
 0x3dd   : > { %1230 = vmatpush2.msra.mxu0 %v1084_v16 }
 0x3de   : > { %1232 = vmatmul.mubr.f32.vlgmr.msra.gmra.mxu0 %v2890_v20  ;;  %v3507_v20 = vld [vmem:[#allocation16_spill] sm:$0xff] }
 0x3df   : > { %1236 = vmatprep.mubr.f32.mxu0 %v2894_v21  ;;  %v3508_v21 = vld [vmem:[#allocation17_spill] sm:$0xff] }
 0x3e2   : > { %1237 = vmatmul.mubr.f32.gmra.mxu0 %v2900_v24  ;;  %v3509_v24 = vld [vmem:[#allocation18_spill] sm:$0xff] }
 0x3e3   : > { %1241 = vmatprep.mubr.f32.mxu0 %v2903_v25  ;;  %v3510_v25 = vld [vmem:[#allocation19_spill] sm:$0xff] }
 0x3e6   : > { %1242 = vmatmul.mubr.f32.gmra.mxu0 %v2908_v28  ;;  %v3511_v28 = vld [vmem:[#allocation20_spill] sm:$0xff] }
 0x3e7   : > { %1246 = vmatprep.mubr.f32.mxu0 %v2911_v29  ;;  %v3512_v29 = vld [vmem:[#allocation21_spill] sm:$0xff] }
 0x3ea   : > { %1247 = vmatmul.mubr.f32.gmra.mxu0 %v2916_v32  ;;  %v3513_v32 = vld [vmem:[#allocation22_spill] sm:$0xff] }
 0x3eb   : > { %1251 = vmatprep.mubr.f32.mxu0 %v2919_v33  ;;  %v3514_v33 = vld [vmem:[#allocation23_spill] sm:$0xff] }
 0x3ee   : > { %1252 = vmatmul.mubr.f32.gmra.mxu0 %v2924_v36  ;;  %v3515_v36 = vld [vmem:[#allocation24_spill] sm:$0xff] }
 0x3ef   : > { %1256 = vmatprep.mubr.f32.mxu0 %v2927_v37  ;;  %v3516_v37 = vld [vmem:[#allocation25_spill] sm:$0xff] }
 0x3f2   : > { %1257 = vmatmul.mubr.f32.gmra.mxu0 %v2932_v40  ;;  %v3517_v40 = vld [vmem:[#allocation26_spill] sm:$0xff] }
 0x3f3   : > { %1261 = vmatprep.mubr.f32.mxu0 %v2935_v41  ;;  %v3518_v41 = vld [vmem:[#allocation27_spill] sm:$0xff] }
 0x3f6   : > { %1262 = vmatmul.mubr.f32.gmra.mxu0 %v2940_v42  ;;  %v3519_v42 = vld [vmem:[#allocation28_spill] sm:$0xff] }
 0x3f7   : > { %1266 = vmatprep.mubr.f32.mxu0 %v2943_v43  ;;  %v3520_v43 = vld [vmem:[#allocation29_spill] sm:$0xff] }
 0x3fa   : > { %1267 = vmatmul.mubr.f32.gmra.mxu0 %v2948_v44  ;;  %v3521_v44 = vld [vmem:[#allocation30_spill] sm:$0xff] }
 0x3fb   : > { %1271 = vmatprep.mubr.f32.mxu0 %v2951_v45  ;;  %v3522_v45 = vld [vmem:[#allocation31_spill] sm:$0xff] }
 0x3fe   : > { %1272 = vmatmul.mubr.f32.gmra.mxu0 %v2956_v46  ;;  %v3523_v46 = vld [vmem:[#allocation32_spill] sm:$0xff] }
 0x3ff   : > { %1276 = vmatprep.mubr.f32.mxu0 %v2959_v47  ;;  %v3524_v47 = vld [vmem:[#allocation33_spill] sm:$0xff] }
 0x402   : > { %1277 = vmatmul.mubr.f32.gmra.mxu0 %v2964_v50  ;;  %v3525_v50 = vld [vmem:[#allocation34_spill] sm:$0xff] }
 0x403   : > { %1281 = vmatprep.mubr.f32.mxu0 %v2967_v51 }
 0x406   : > { %1282 = vmatmul.mubr.f32.gmra.mxu0 %v2972_v52 }
 0x407   : > { %1286 = vmatprep.mubr.f32.mxu0 %v2975_v53 }
 0x40a   : > { %1287 = vmatmul.mubr.f32.gmra.mxu0 %v2980_v54 }
 0x40b   : > { %1291 = vmatprep.mubr.f32.mxu0 %v2983_v55 }
 0x40e   : > { %1292 = vmatmul.mubr.f32.gmra.mxu0 %v2988_v56 }
 0x40f   : > { %1296 = vmatprep.mubr.f32.mxu0 %v2991_v57 }
 0x412   : > { %1297 = vmatmul.mubr.f32.gmra.mxu0 %v2996_v58 }
 0x413   : > { %1301 = vmatprep.mubr.f32.mxu0 %v2999_v59 }
 0x416   : > { %1302 = vmatmul.mubr.f32.gmra.mxu0 %v3004_v60 }
 0x417   : > { %1306 = vmatprep.mubr.f32.mxu0 %v3007_v61 }
 0x41a   : > { %1307 = vmatmul.mubr.f32.gmra.mxu0 %v3012_v62 }
 0x41b   : > { %1311 = vmatprep.mubr.f32.mxu0 %v3015_v63 }
 0x41e   : > { %1312 = vmatmul.mubr.f32.gmra.mxu0 %v3020_v0 }
 0x41f   : > { %1316 = vmatprep.mubr.f32.mxu0 %v3023_v1 }
 0x422   : > { %1317 = vmatmul.mubr.f32.gmra.mxu0 %v3028_v3 }
 0x423   : > { %1321 = vmatprep.mubr.f32.mxu0 %v3031_v4  ;;  %v411_v4 = vld [vmem:[#allocation7 + $0x8] sm:$0xff] }
 0x424   : > { %1488 = vmatprep.mubr.f32.mxu1 %v411_v4 }
 0x426   : > { %1322 = vmatmul.mubr.f32.gmra.mxu0 %v3036_v7 }
 0x427   : > { %1326 = vmatprep.mubr.f32.mxu0 %v3039_v8 }
 0x42a   : > { %1327 = vmatmul.mubr.f32.gmra.mxu0 %v3044_v10 }
 0x42b   : > { %1331 = vmatprep.mubr.f32.mxu0 %v3048_v11 }
 0x42e   : > { %1332 = vmatmul.mubr.f32.gmra.mxu0 %v3053_v12 }
 0x42f   : > { %1336 = vmatprep.mubr.f32.mxu0 %v3056_v13 }
 0x432   : > { %1337 = vmatmul.mubr.f32.gmra.mxu0 %v3061_v14 }
 0x433   : > { %1341 = vmatprep.mubr.f32.mxu0 %v3064_v15 }
 0x436   : > { %1342 = vmatmul.mubr.f32.gmra.mxu0 %v3507_v20 }
 0x437   : > { %1346 = vmatprep.mubr.f32.mxu0 %v3508_v21 }
 0x43a   : > { %1347 = vmatmul.mubr.f32.gmra.mxu0 %v3509_v24 }
 0x43b   : > { %1351 = vmatprep.mubr.f32.mxu0 %v3510_v25 }
 0x43e   : > { %1352 = vmatmul.mubr.f32.gmra.mxu0 %v3511_v28 }
 0x43f   : > { %1356 = vmatprep.mubr.f32.mxu0 %v3512_v29 }
 0x442   : > { %1357 = vmatmul.mubr.f32.gmra.mxu0 %v3513_v32 }
 0x443   : > { %1361 = vmatprep.mubr.f32.mxu0 %v3514_v33 }
 0x446   : > { %1362 = vmatmul.mubr.f32.gmra.mxu0 %v3515_v36 }
 0x447   : > { %1366 = vmatprep.mubr.f32.mxu0 %v3516_v37 }
 0x44a   : > { %1367 = vmatmul.mubr.f32.gmra.mxu0 %v3517_v40 }
 0x44b   : > { %1371 = vmatprep.mubr.f32.mxu0 %v3518_v41 }
 0x44e   : > { %1372 = vmatmul.mubr.f32.gmra.mxu0 %v3519_v42 }
 0x44f   : > { %1376 = vmatprep.mubr.f32.mxu0 %v3520_v43 }
 0x452   : > { %1377 = vmatmul.mubr.f32.gmra.mxu0 %v3521_v44 }
 0x453   : > { %1381 = vmatprep.mubr.f32.mxu0 %v3522_v45  ;;  %v3526_v45 = vld [vmem:[#allocation35_spill] sm:$0xff] }
 0x456   : > { %1382 = vmatmul.mubr.f32.gmra.mxu0 %v3523_v46  ;;  %v1165_v46 = vsub.s32 1, %v3526_v45 }
 0x457   : > { %1386 = vmatprep.mubr.f32.mxu0 %v3524_v47 }
 0x45a   : > { %1387 = vmatmul.mubr.f32.gmra.mxu0 %v3525_v50 }
 0x49e   : > { %v3282_v51 = vpop.f32.mrf.mxu0 }
 0x4a0   : > { %v1235_v52 = vpop.f32.mrf.mxu0 }
 0x4a1   : > { %v3527_v52 = vld [vmem:[#allocation36_spill] sm:$0xff] }
 0x4a2   : > { %v3284_v53 = vpop.f32.mrf.mxu0 }
 0x4a4   : > { %v1240_v54 = vpop.f32.mrf.mxu0 }
 0x4a5   : > { %v3320_v54 = vrot.slane %v3527_v52, %v1165_v46 }
 0x4a6   : > { %v3286_v55 = vpop.f32.mrf.mxu0 }
 0x4a8   : > { %v1245_v56 = vpop.f32.mrf.mxu0 }
 0x4aa   : > { %v3288_v57 = vpop.f32.mrf.mxu0 }
 0x4ac   : > { %v1250_v58 = vpop.f32.mrf.mxu0 }
 0x4ae   : > { %v3290_v59 = vpop.f32.mrf.mxu0 }
 0x4b0   : > { %v1255_v60 = vpop.f32.mrf.mxu0 }
 0x4b2   : > { %v3292_v61 = vpop.f32.mrf.mxu0 }
 0x4b4   : > { %v1260_v62 = vpop.f32.mrf.mxu0 }
 0x4b6   : > { %v3294_v63 = vpop.f32.mrf.mxu0 }
 0x4b8   : > { %v1265_v0 = vpop.f32.mrf.mxu0 }
 0x4ba   : > { %v3296_v1 = vpop.f32.mrf.mxu0 }
 0x4bc   : > { %v1270_v3 = vpop.f32.mrf.mxu0 }
 0x4be   : > { %v3298_v7 = vpop.f32.mrf.mxu0 }
 0x4c0   : > { %v1275_v8 = vpop.f32.mrf.mxu0 }
 0x4c2   : > { %v3300_v10 = vpop.f32.mrf.mxu0 }
 0x4c4   : > { %v1280_v11 = vpop.f32.mrf.mxu0 }
 0x4c6   : > { %v3302_v12 = vpop.f32.mrf.mxu0 }
 0x4c8   : > { %v1285_v13 = vpop.f32.mrf.mxu0 }
 0x4ca   : > { %v1288_v14 = vpop.f32.mrf.mxu0 }
 0x4cc   : > { %v1290_v15 = vpop.f32.mrf.mxu0 }
 0x4ce   : > { %v1293_v9 = vpop.f32.mrf.mxu0 }
 0x4d0   : > { %v1295_v34 = vpop.f32.mrf.mxu0 }
 0x4d2   : > { %v1298_v19 = vpop.f32.mrf.mxu0 }
 0x4d3   : > { %v1299_v13 = vadd.f32 %v1298_v19, %v3320_v54 }
 0x4d4   : > { %v1300_v35 = vpop.f32.mrf.mxu0 }
 0x4d6   : > { %v1303_v49 = vpop.f32.mrf.mxu0 }
 0x4d7   : > { %v1304_v3 = vadd.f32 %v1303_v49, %v3320_v54  ;;  %v1289_v49 = vadd.f32 %v1288_v14, %v3320_v54 }
 0x4d8   : > { %v1305_v16 = vpop.f32.mrf.mxu0 }
 0x4d9   : > { %v1294_v16 = vadd.f32 %v1293_v9, %v3320_v54 }
 0x4da   : > { %v1308_v17 = vpop.f32.mrf.mxu0 }
 0x4db   : > { %v1309_v58 = vadd.f32 %v1308_v17, %v3320_v54  ;;  %v1406_v17 = vmax.f32 %v1304_v3, 0.0 }
 0x4dc   : > { %v1310_v18 = vpop.f32.mrf.mxu0 }
 0x4dd   : > { %v1407_v15 = vmax.f32 %v1309_v58, 0.0 }
 0x4de   : > { %v3304_v5 = vpop.f32.mrf.mxu0 }
 0x4e0   : > { %v1315_v6 = vpop.f32.mrf.mxu0 }
 0x4e2   : > { %v3306_v48 = vpop.f32.mrf.mxu0 }
 0x4e4   : > { %v1320_v39 = vpop.f32.mrf.mxu0 }
 0x4e5   : > { %v1405_v39 = vmax.f32 %v1299_v13, 0.0  ;;  %v413_v13 = vld [vmem:[#allocation7 + $0x18] sm:$0xff] }
 0x4e6   : > { %v3308_v38 = vpop.f32.mrf.mxu0 }
 0x4e8   : > { %v1325_v31 = vpop.f32.mrf.mxu0 }
 0x4ea   : > { %v3310_v27 = vpop.f32.mrf.mxu0 }
 0x4ec   : > { %v1330_v23 = vpop.f32.mrf.mxu0 }
 0x4ed   : > { %v1284_v23 = vadd.f32 %v3302_v12, %v3320_v54 }
 0x4ee   : > { %v3312_v26 = vpop.f32.mrf.mxu0 }
 0x4f0   : > { %v1335_v30 = vpop.f32.mrf.mxu0 }
 0x4f1   : > { %v1404_v30 = vmax.f32 %v1294_v16, 0.0  ;;  %v1521_v16 = vld [vmem:[#allocation8 + $0x158] sm:$0xff] }
 0x4f2   : > { %v3314_v2 = vpop.f32.mrf.mxu0 }
 0x4f4   : > { %v1340_v22 = vpop.f32.mrf.mxu0 }
 0x4f6   : > { %v3316_v20 = vpop.f32.mrf.mxu0 }
 0x4f8   : > { %v1345_v21 = vpop.f32.mrf.mxu0 }
 0x4f9   : > { %v1279_v21 = vadd.f32 %v3300_v10, %v3320_v54  ;;  %v1344_v10 = vadd.f32 %v3316_v20, %v3320_v54  ;;  %v1334_v20 = vadd.f32 %v3312_v26, %v3320_v54  ;;  %v1324_v26 = vadd.f32 %v3308_v38, %v3320_v54 }
 0x4fa   : > { %v1348_v24 = vpop.f32.mrf.mxu0  ;;  %v1314_v38 = vadd.f32 %v3304_v5, %v3320_v54  ;;  %v1524_v5 = vld [vmem:[#allocation8 + $0x170] sm:$0xff] }
 0x4fb   : > { %v1349_v12 = vadd.f32 %v1348_v24, %v3320_v54  ;;  %v1339_v24 = vadd.f32 %v3314_v2, %v3320_v54  ;;  %v1329_v2 = vadd.f32 %v3310_v27, %v3320_v54  ;;  %v1412_v52 = vmax.f32 %v1334_v20, 0.0 }
 0x4fc   : > { %v1350_v25 = vpop.f32.mrf.mxu0  ;;  %v1319_v27 = vadd.f32 %v3306_v48, %v3320_v54 }
 0x4fd   : > { %v1403_v25 = vmax.f32 %v1289_v49, 0.0  ;;  %v1411_v58 = vmax.f32 %v1329_v2, 0.0  ;;  %v1519_v49 = vld [vmem:[#allocation8 + $0x148] sm:$0xff]  ;;  %v1627_v2 = vld [vmem:[#allocation8 + $0x1b8] sm:$0xff] }
 0x4fe   : > { %v1353_v28 = vpop.f32.mrf.mxu0  ;;  %v1409_v3 = vmax.f32 %v1319_v27, 0.0  ;;  %v1528_v27 = vsub.s32 2, %v3526_v45 }
 0x4ff   : > { %v1354_v14 = vadd.f32 %v1353_v28, %v3320_v54 }
 0x500   : > { %v1355_v29 = vpop.f32.mrf.mxu0 }
 0x501   : > { %v1416_v28 = vmax.f32 %v1354_v14, 0.0  ;;  %v1635_v14 = vld [vmem:[#allocation8 + $0x1f8] sm:$0xff] }
 0x502   : > { %v1358_v32 = vpop.f32.mrf.mxu0 }
 0x503   : > { %v1359_v9 = vadd.f32 %v1358_v32, %v3320_v54  ;;  %v1269_v32 = vadd.f32 %v3296_v1, %v3320_v54  ;;  %v1259_v1 = vadd.f32 %v3292_v61, %v3320_v54  ;;  %v1249_v61 = vadd.f32 %v3288_v57, %v3320_v54 }
 0x504   : > { %v1360_v33 = vpop.f32.mrf.mxu0  ;;  %v1239_v57 = vadd.f32 %v3284_v53, %v3320_v54  ;;  %v410_v53 = vld [vmem:[#allocation7] sm:$0xff] }
 0x505   : > { %v1274_v33 = vadd.f32 %v3298_v7, %v3320_v54 }
 0x506   : > { %v1363_v36 = vpop.f32.mrf.mxu0  ;;  %v1393_v48 = vmax.f32 %v1239_v57, 0.0 }
 0x507   : > { %v1364_v31 = vadd.f32 %v1363_v36, %v3320_v54  ;;  %v1402_v36 = vmax.f32 %v1284_v23, 0.0  ;;  %v1400_v7 = vmax.f32 %v1274_v33, 0.0  ;;  %v1515_v23 = vld [vmem:[#allocation8 + $0x128] sm:$0xff] }
 0x508   : > { %v1365_v37 = vpop.f32.mrf.mxu0 }
 0x509   : > { %v1418_v29 = vmax.f32 %v1364_v31, 0.0  ;;  %v1417_v37 = vmax.f32 %v1359_v9, 0.0  ;;  %v1517_v31 = vld [vmem:[#allocation8 + $0x138] sm:$0xff] }
 0x50a   : > { %v1368_v40 = vpop.f32.mrf.mxu0  ;;  %v1513_v9 = vld [vmem:[#allocation8 + $0x118] sm:$0xff] }
 0x50b   : > { %v1369_v18 = vadd.f32 %v1368_v40, %v3320_v54  ;;  %v1401_v40 = vmax.f32 %v1279_v21, 0.0  ;;  %v1511_v21 = vld [vmem:[#allocation8 + $0x108] sm:$0xff] }
 0x50c   : > { %v1370_v41 = vpop.f32.mrf.mxu0 }
 0x50d   : > { %v1419_v22 = vmax.f32 %v1369_v18, 0.0  ;;  %v1264_v41 = vadd.f32 %v3294_v63, %v3320_v54  ;;  %v1254_v63 = vadd.f32 %v3290_v59, %v3320_v54  ;;  %v1244_v59 = vadd.f32 %v3286_v55, %v3320_v54  ;;  %v1520_v18 = vld [vmem:[#allocation8 + $0x150] sm:$0xff] }
 0x50e   : > { %v1373_v42 = vpop.f32.mrf.mxu0  ;;  %v1234_v55 = vadd.f32 %v3282_v51, %v3320_v54  ;;  %v412_v51 = vld [vmem:[#allocation7 + $0x10] sm:$0xff] }
 0x50f   : > { %v1374_v34 = vadd.f32 %v1373_v42, %v3320_v54  ;;  %v1415_v42 = vmax.f32 %v1349_v12, 0.0  ;;  %v1398_v46 = vmax.f32 %v1264_v41, 0.0  ;;  %v1633_v41 = vld [vmem:[#allocation8 + $0x1e8] sm:$0xff] }
 0x510   : > { %v1375_v43 = vpop.f32.mrf.mxu0 }
 0x511   : > { %v1420_v19 = vmax.f32 %v1374_v34, 0.0  ;;  %v1399_v43 = vmax.f32 %v1269_v32, 0.0  ;;  %v1522_v34 = vld [vmem:[#allocation8 + $0x160] sm:$0xff] }
 0x512   : > { %v1378_v44 = vpop.f32.mrf.mxu0 }
 0x513   : > { %v1379_v8 = vadd.f32 %v1378_v44, %v3320_v54  ;;  %v1414_v44 = vmax.f32 %v1344_v10, 0.0  ;;  %v1634_v10 = vld [vmem:[#allocation8 + $0x1f0] sm:$0xff] }
 0x514   : > { %v1380_v47 = vpop.f32.mrf.mxu0 }
 0x515   : > { %v1421_v6 = vmax.f32 %v1379_v8, 0.0  ;;  %v1413_v47 = vmax.f32 %v1339_v24, 0.0  ;;  %v1392_v8 = vmax.f32 %v1234_v55, 0.0 }
 0x516   : > { %v1383_v50 = vpop.f32.mrf.mxu0 }
 0x517   : > { %v1384_v62 = vadd.f32 %v1383_v50, %v3320_v54  ;;  %v1397_v50 = vmax.f32 %v1259_v1, 0.0 }
 0x518   : > { %v1385_v56 = vpop.f32.mrf.mxu0 }
 0x519   : > { %v1422_v35 = vmax.f32 %v1384_v62, 0.0  ;;  %v1396_v56 = vmax.f32 %v1254_v63, 0.0  ;;  %v1410_v62 = vmax.f32 %v1324_v26, 0.0  ;;  %v1629_v63 = vld [vmem:[#allocation8 + $0x1c8] sm:$0xff]  ;;  %v1623_v26 = vld [vmem:[#allocation8 + $0x198] sm:$0xff] }
 0x51a   : > { %v1388_v60 = vpop.f32.mrf.mxu0 }
 0x51b   : > { %v1389_v0 = vadd.f32 %v1388_v60, %v3320_v54  ;;  %v1395_v60 = vmax.f32 %v1249_v61, 0.0  ;;  %v1523_v54 = vld [vmem:[#allocation8 + $0x168] sm:$0xff] }
 0x51c   : > { %v1390_v4 = vpop.f32.mrf.mxu0  ;;  %v1625_v61 = vld [vmem:[#allocation8 + $0x1a8] sm:$0xff] }
 0x51d   : > { %v1423_v11 = vmax.f32 %v1389_v0, 0.0  ;;  %v1394_v0 = vmax.f32 %v1244_v59, 0.0  ;;  %v1408_v4 = vmax.f32 %v1314_v38, 0.0  ;;  %v1621_v59 = vld [vmem:[#allocation8 + $0x188] sm:$0xff] }
 0x51f   : > { %1979 = vmatprep.subr.mxu1 %v1423_v11  ;;  %v1525_v11 = vld [vmem:[#allocation8 + $0x178] sm:$0xff] }
 0x520   : > { %1980 = vmatpush3.msra.mxu1 %v1407_v15  ;;  %v415_v15 = vld [vmem:[#allocation7 + $0x28] sm:$0xff] }
 0x521   : > { %1981 = vmatprep.subr.mxu1 %v1422_v35  ;;  %v414_v35 = vld [vmem:[#allocation7 + $0x20] sm:$0xff] }
 0x522   : > { %1982 = vmatpush3.msra.mxu1 %v1406_v17  ;;  %v417_v17 = vld [vmem:[#allocation7 + $0x38] sm:$0xff] }
 0x523   : > { %1983 = vmatprep.subr.mxu1 %v1421_v6  ;;  %v416_v6 = vld [vmem:[#allocation7 + $0x30] sm:$0xff] }
 0x524   : > { %1984 = vmatpush3.msra.mxu1 %v1405_v39  ;;  %v1518_v39 = vld [vmem:[#allocation8 + $0x140] sm:$0xff] }
 0x525   : > { %1985 = vmatprep.subr.mxu1 %v1420_v19  ;;  %v1516_v19 = vld [vmem:[#allocation8 + $0x130] sm:$0xff] }
 0x526   : > { %1986 = vmatpush3.msra.mxu1 %v1404_v30  ;;  %v1514_v30 = vld [vmem:[#allocation8 + $0x120] sm:$0xff] }
 0x527   : > { %1987 = vmatprep.subr.mxu1 %v1419_v22  ;;  %v1512_v22 = vld [vmem:[#allocation8 + $0x110] sm:$0xff] }
 0x528   : > { %1988 = vmatpush3.msra.mxu1 %v1403_v25  ;;  %v1510_v25 = vld [vmem:[#allocation8 + $0x100] sm:$0xff] }
 0x529   : > { %1989 = vmatprep.subr.mxu1 %v1418_v29 }
 0x52a   : > { %1990 = vmatpush3.msra.mxu1 %v1402_v36 }
 0x52b   : > { %1991 = vmatprep.subr.mxu1 %v1417_v37 }
 0x52c   : > { %1992 = vmatpush3.msra.mxu1 %v1401_v40 }
 0x52d   : > { %1993 = vmatprep.subr.mxu1 %v1416_v28 }
 0x52e   : > { %1994 = vmatpush3.msra.mxu1 %v1400_v7 }
 0x52f   : > { %1995 = vmatprep.subr.mxu1 %v1415_v42  ;;  %v1632_v42 = vld [vmem:[#allocation8 + $0x1e0] sm:$0xff] }
 0x530   : > { %1996 = vmatpush3.msra.mxu1 %v1399_v43  ;;  %v1631_v43 = vld [vmem:[#allocation8 + $0x1d8] sm:$0xff] }
 0x531   : > { %1997 = vmatprep.subr.mxu1 %v1414_v44  ;;  %v1630_v44 = vld [vmem:[#allocation8 + $0x1d0] sm:$0xff] }
 0x532   : > { %1998 = vmatpush3.msra.mxu1 %v1398_v46  ;;  %v1628_v46 = vld [vmem:[#allocation8 + $0x1c0] sm:$0xff] }
 0x533   : > { %1999 = vmatprep.subr.mxu1 %v1413_v47  ;;  %v1626_v47 = vld [vmem:[#allocation8 + $0x1b0] sm:$0xff] }
 0x534   : > { %2000 = vmatpush3.msra.mxu1 %v1397_v50  ;;  %v1624_v50 = vld [vmem:[#allocation8 + $0x1a0] sm:$0xff] }
 0x535   : > { %2001 = vmatprep.subr.mxu1 %v1412_v52  ;;  %v1622_v52 = vld [vmem:[#allocation8 + $0x190] sm:$0xff] }
 0x536   : > { %2002 = vmatpush3.msra.mxu1 %v1396_v56  ;;  %v1620_v56 = vld [vmem:[#allocation8 + $0x180] sm:$0xff] }
 0x537   : > { %2003 = vmatprep.subr.mxu1 %v1411_v58  ;;  %v2378_v58 = vld [vmem:[%s3431_s4] sm:$0xf] }
 0x538   : > { %2004 = vmatpush3.msra.mxu1 %v1395_v60  ;;  %v1529_v57 = vrot.slane %v2378_v58, %v1528_v27 }
 0x539   : > { %2005 = vmatprep.subr.mxu1 %v1410_v62 }
 0x53a   : > { %2006 = vmatpush3.msra.mxu1 %v1394_v0 }
 0x53b   : > { %2007 = vmatprep.subr.mxu1 %v1409_v3 }
 0x53c   : > { %2008 = vmatpush3.msra.mxu1 %v1393_v48 }
 0x53d   : > { %2009 = vmatprep.subr.mxu1 %v1408_v4 }
 0x53e   : > { %2010 = vmatpush3.msra.mxu1 %v1392_v8 }
 0x53f   : > { %1489 = vmatmul.mubr.f32.vlgmr.msra.gmra.mxu1 %v410_v53  ;;  %2223 = vmatprep.subr.mxu1 %v1525_v11 }
 0x540   : > { %1493 = vmatprep.mubr.f32.mxu1 %v413_v13  ;;  %2224 = vmatpush3.msra.mxu1 %v1525_v11 }
 0x541   : > { %2225 = vmatprep.subr.mxu1 %v1524_v5 }
 0x542   : > { %2226 = vmatpush3.msra.mxu1 %v1524_v5  ;;  %v1638_v5 = vsub.s32 3, %v3526_v45 }
 0x543   : > { %1494 = vmatmul.mubr.f32.gmra.mxu1 %v412_v51  ;;  %2227 = vmatprep.subr.mxu1 %v1523_v54 }
 0x544   : > { %1498 = vmatprep.mubr.f32.mxu1 %v415_v15  ;;  %2228 = vmatpush3.msra.mxu1 %v1523_v54  ;;  %v1639_v51 = vrot.slane %v2378_v58, %v1638_v5 }
 0x545   : > { %2229 = vmatprep.subr.mxu1 %v1522_v34 }
 0x546   : > { %2230 = vmatpush3.msra.mxu1 %v1522_v34 }
 0x547   : > { %1499 = vmatmul.mubr.f32.gmra.mxu1 %v414_v35  ;;  %2231 = vmatprep.subr.mxu1 %v1521_v16 }
 0x548   : > { %1503 = vmatprep.mubr.f32.mxu1 %v417_v17  ;;  %2232 = vmatpush3.msra.mxu1 %v1521_v16 }
 0x549   : > { %2233 = vmatprep.subr.mxu1 %v1520_v18 }
 0x54a   : > { %2234 = vmatpush3.msra.mxu1 %v1520_v18 }
 0x54b   : > { %1504 = vmatmul.mubr.f32.gmra.mxu1 %v416_v6  ;;  %2235 = vmatprep.subr.mxu1 %v1519_v49 }
 0x54c   : > { %2236 = vmatpush3.msra.mxu1 %v1519_v49 }
 0x54d   : > { %2237 = vmatprep.subr.mxu1 %v1518_v39 }
 0x54e   : > { %2238 = vmatpush3.msra.mxu1 %v1518_v39 }
 0x54f   : > { %2239 = vmatprep.subr.mxu1 %v1517_v31 }
 0x550   : > { %2240 = vmatpush3.msra.mxu1 %v1517_v31 }
 0x551   : > { %2241 = vmatprep.subr.mxu1 %v1516_v19 }
 0x552   : > { %2242 = vmatpush3.msra.mxu1 %v1516_v19 }
 0x553   : > { %2243 = vmatprep.subr.mxu1 %v1515_v23 }
 0x554   : > { %2244 = vmatpush3.msra.mxu1 %v1515_v23 }
 0x555   : > { %2245 = vmatprep.subr.mxu1 %v1514_v30 }
 0x556   : > { %2246 = vmatpush3.msra.mxu1 %v1514_v30 }
 0x557   : > { %2247 = vmatprep.subr.mxu1 %v1513_v9 }
 0x558   : > { %2248 = vmatpush3.msra.mxu1 %v1513_v9 }
 0x559   : > { %2249 = vmatprep.subr.mxu1 %v1512_v22 }
 0x55a   : > { %2250 = vmatpush3.msra.mxu1 %v1512_v22 }
 0x55b   : > { %2251 = vmatprep.subr.mxu1 %v1511_v21 }
 0x55c   : > { %2252 = vmatpush3.msra.mxu1 %v1511_v21 }
 0x55d   : > { %2253 = vmatprep.subr.mxu1 %v1510_v25 }
 0x55e   : > { %2254 = vmatpush3.msra.mxu1 %v1510_v25 }
 0x55f   : > { %2261 = vmatprep.subr.mxu1 %v1635_v14 }
 0x5ff   : > { %v2011_v29 = vpop.f32.mrf.mxu1 }
 0x601   : > { %v2012_v33 = vpop.f32.mrf.mxu1 }
 0x602   : > { %v2013_v36 = vadd.f32 %v2012_v33, %v2011_v29 }
 0x603   : > { %v2014_v12 = vpop.f32.mrf.mxu1 }
 0x604   : > { %2255 = vmatprep.mubr.f32.mxu1 %v2013_v36 }
 0x605   : > { %v2015_v37 = vpop.f32.mrf.mxu1 }
 0x606   : > { %v2016_v32 = vadd.f32 %v2015_v37, %v2014_v12 }
 0x607   : > { %v2017_v40 = vpop.f32.mrf.mxu1 }
 0x608   : > { %2256 = vmatmul.mubr.f32.vlgmr.msra.gmra.mxu1 %v2016_v32 }
 0x609   : > { %v2018_v28 = vpop.f32.mrf.mxu1  ;;  %2262 = vmatpush3.msra.mxu1 %v1635_v14 }
 0x60a   : > { %v2019_v7 = vadd.f32 %v2018_v28, %v2017_v40  ;;  %2263 = vmatprep.subr.mxu1 %v1634_v10 }
 0x60b   : > { %v2020_v24 = vpop.f32.mrf.mxu1  ;;  %2264 = vmatpush3.msra.mxu1 %v1634_v10 }
 0x60c   : > { %2258 = vmatprep.mubr.f32.mxu1 %v2019_v7  ;;  %2265 = vmatprep.subr.mxu1 %v1633_v41 }
 0x60d   : > { %v2021_v1 = vpop.f32.mrf.mxu1  ;;  %2266 = vmatpush3.msra.mxu1 %v1633_v41 }
 0x60e   : > { %v2022_v20 = vadd.f32 %v2021_v1, %v2020_v24  ;;  %2267 = vmatprep.subr.mxu1 %v1632_v42 }
 0x60f   : > { %2268 = vmatpush3.msra.mxu1 %v1632_v42 }
 0x610   : > { %2259 = vmatmul.mubr.f32.gmra.mxu1 %v2022_v20  ;;  %2269 = vmatprep.subr.mxu1 %v1631_v43 }
 0x611   : > { %2270 = vmatpush3.msra.mxu1 %v1631_v43 }
 0x612   : > { %2271 = vmatprep.subr.mxu1 %v1630_v44 }
 0x613   : > { %2272 = vmatpush3.msra.mxu1 %v1630_v44 }
 0x614   : > { %2273 = vmatprep.subr.mxu1 %v1629_v63 }
 0x615   : > { %2274 = vmatpush3.msra.mxu1 %v1629_v63 }
 0x616   : > { %2275 = vmatprep.subr.mxu1 %v1628_v46 }
 0x617   : > { %2276 = vmatpush3.msra.mxu1 %v1628_v46 }
 0x618   : > { %2277 = vmatprep.subr.mxu1 %v1627_v2 }
 0x619   : > { %2278 = vmatpush3.msra.mxu1 %v1627_v2 }
 0x61a   : > { %2279 = vmatprep.subr.mxu1 %v1626_v47 }
 0x61b   : > { %2280 = vmatpush3.msra.mxu1 %v1626_v47 }
 0x61c   : > { %2281 = vmatprep.subr.mxu1 %v1625_v61 }
 0x61d   : > { %2282 = vmatpush3.msra.mxu1 %v1625_v61 }
 0x61e   : > { %2283 = vmatprep.subr.mxu1 %v1624_v50 }
 0x61f   : > { %2284 = vmatpush3.msra.mxu1 %v1624_v50 }
 0x620   : > { %2285 = vmatprep.subr.mxu1 %v1623_v26 }
 0x621   : > { %2286 = vmatpush3.msra.mxu1 %v1623_v26 }
 0x622   : > { %2287 = vmatprep.subr.mxu1 %v1622_v52 }
 0x623   : > { %2288 = vmatpush3.msra.mxu1 %v1622_v52 }
 0x624   : > { %2289 = vmatprep.subr.mxu1 %v1621_v59 }
 0x625   : > { %2290 = vmatpush3.msra.mxu1 %v1621_v59 }
 0x626   : > { %2291 = vmatprep.subr.mxu1 %v1620_v56 }
 0x627   : > { %2292 = vmatpush3.msra.mxu1 %v1620_v56 }
 0x6c8   : > { %v2257_v60 = vpop.f32.mrf.mxu1 }
 0x6c9   : > { %v1602_v38 = vadd.f32 %v2257_v60, %v1529_v57 }
 0x6ca   : > { %v1596_v62 = vpop.f32.mrf.mxu1 }
 0x6cb   : > { %v1597_v55 = vadd.f32 %v1596_v62, %v1529_v57  ;;  %v1616_v3 = vmax.f32 %v1602_v38, 0.0 }
 0x6cd   : > { %v1615_v0 = vmax.f32 %v1597_v55, 0.0 }
 0x6cf   : > { %2293 = vmatprep.mubr.f32.mxu1 %v1615_v0 }
 0x6d0   : > { %v2260_v48 = vpop.f32.mrf.mxu1  ;;  %2294 = vmatmul.mubr.f32.vlgmr.msra.gmra.mxu1 %v1616_v3 }
 0x6d1   : > { %v1612_v4 = vadd.f32 %v2260_v48, %v1529_v57 }
 0x6d2   : > { %v1606_v8 = vpop.f32.mrf.mxu1 }
 0x6d3   : > { %v1607_v53 = vadd.f32 %v1606_v8, %v1529_v57  ;;  %v1618_v13 = vmax.f32 %v1612_v4, 0.0 }
 0x6d5   : > { %v1617_v11 = vmax.f32 %v1607_v53, 0.0 }
 0x6d7   : > { %2296 = vmatprep.mubr.f32.mxu1 %v1617_v11 }
 0x6d8   : > { %2297 = vmatmul.mubr.f32.gmra.mxu1 %v1618_v13 }
 0x790   : > { %v2295_v54 = vpop.f32.mrf.mxu1 }
 0x791   : > { %v1712_v15 = vadd.f32 %v2295_v54, %v1639_v51 }
 0x792   : > { %v1706_v34 = vpop.f32.mrf.mxu1 }
 0x793   : > { %1726 = vst [vmem:[%s311_s0 + $0x8] sm:$0xff] %v1712_v15  ;;  %v1707_v35 = vadd.f32 %v1706_v34, %v1639_v51 }
 0x795   : > { %1725 = vst [vmem:[%s311_s0] sm:$0xff] %v1707_v35 }
 0x798   : > { %v2298_v16 = vpop.f32.mrf.mxu1 }
 0x799   : > { %v1722_v45 = vadd.f32 %v2298_v16, %v1639_v51 }
 0x79a   : > { %v1716_v17 = vpop.f32.mrf.mxu1 }
 0x79b   : > { %1728 = vst [vmem:[%s311_s0 + $0x18] sm:$0xff] %v1722_v45  ;;  %v1717_v18 = vadd.f32 %v1716_v17, %v1639_v51 }
 0x79d   : > { %1727 = vst [vmem:[%s311_s0 + $0x10] sm:$0xff] %v1717_v18 }
 0x79e   : > { %2500 = shalt.err (!%p2497_p4)
}
 0x79f   : > { %s2501_s26 = scalar_lea.hbm %s3384_s8, 512  ;;  %s2505_s24 = scalar_lea.hbm %s3432_s5, 1024 }
 0x7a0   : > { %p2502_p10 = scmp.ne.s32.totalorder %s3384_s8, %s2501_s26  ;;  %p2506_p2 = scmp.lt.s32.totalorder %s3384_s8, %s3432_s5 }
 0x7a1   : > { %p2507_p6 = scmp.lt.s32.totalorder %s2505_s24, %s2501_s26 }
 0x7a2   : > { %p2503_p7 = pnand %p2502_p10, %p3528_p5 }
 0x7a3   : > { %p2508_p12 = por %p2507_p6, %p2506_p2 }
 0x7a4   : > { %p2504_p8 = pneg %p2503_p7 }
 0x7a6   : > { %p2509_p0 = pnand %p2508_p12, %p2504_p8 }
 0x7a8   : > { %2512 = shalt.err (!%p2509_p0)
}
 0x7a9   : > { %s2575_s30 = smov 128   ;;  %s2576_s16 = smov 8  }
 0x7aa   : > { %2311 = dma.vmem_to_hbm [thread:$0]  (%p3528_p5), %s3379_s13, 512, %s3384_s8, %s1730_s6, %s2575_s30, %s2575_s30, %s2576_s16  }
 0x7ab PF: > { %s1758_s0 = sand.u32 1, %s2551_s18   ;;  %p3529_p3 = scmp.ne.s32.totalorder %s3467_s25, 0 }
 0x7ac   : > { %p3530_p11 = scmp.ge.s32.totalorder %s2563_s21, 2  ;;  %s1759_s10 = scalar_lea.sflag [#allocation4], %s1758_s0 }
 0x7ae   : > { %p2328_p9 = pnand %p3530_p11, %p3529_p3 }
 0x7b0   : > { %p2329_p13 = pneg %p2328_p9 }
 0x7b2   : > { %2546 = dma.done.wait (%p2329_p13), %s1759_s10, 512  }
 0x7b3   : > { %2548 = vsyncadd (%p2329_p13), %s1759_s10, 4294966784  ;;  %p22_p1 = scmp.ge.s32.totalorder %s2685_s17, 4   ;;  %s3531_s18 = smov %s2555_s19 }
 0x7b4   : > { %s3532_s19 = smov %s2559_s20  ;;  %s3533_s20 = smov %s2694_s28 }
 0x7b5   : > { %s3534_s21 = smov %s2685_s17  ;;  %24 = sbr.rel (!%p22_p1) target bundleno = 12 (0xc), region = 109 }
 0x7ba   :  { %1764 = vsyncpa [#allocation3], 1 }
 0x7bb   :  { %1766 = vsyncpa [#allocation3 + $0x1], 1 }
 0x7bc   :  { %1767 = vsyncpa [#allocation6], 1 }
 0x7bd   :  { %1769 = vsyncpa [#allocation6 + $0x1], 1 }
 0x7be   :  { %1770 = vsyncpa [#allocation9], 1 }
 0x7bf   :  { %1771 = vsyncpa [#allocation4], 1 }
 0x7c0   :  { %1773 = vsyncpa [#allocation4 + $0x1], 1 }

</bundles_post_ra>
